<compile_context>
chip_gen: v5e
topology: v5e:2x2
jax: 0.10.0
libtpu: 0.0.40
codegen_flags: <defaults>
</compile_context>

<pallas_src>
import functools

import jax
import jax.numpy as jnp
import numpy as np
from jax.experimental import pallas as pl
from jax.experimental.pallas import tpu as pltpu

EPS = 1e-5
LANE = 128                       # pad Cout up to a multiple of the lane width
TM_DEFAULT = 512                 # rows (N*OH*OW) per grid step; safe on v5e/v6e/v7x
VMEM_LIMIT = 48 * 1024 * 1024    # > 16/32 MiB scoped defaults, < 64 MiB v7x physical
MXU_DTYPE = jnp.bfloat16         # matmul operand dtype (accumulation stays f32)


# ----------------------------- Pallas kernels ------------------------------ #

def _conv_stats_kernel(p_ref, w_ref, y_ref, s_ref, ss_ref):
    """Pass 1: per-tile matmul (bf16 operands, f32 acc on the MXU) + cross-tile
    per-channel sum / sum-of-squares accumulation (two-pass BatchNorm)."""
    i = pl.program_id(0)
    y = jnp.dot(p_ref[...], w_ref[...], preferred_element_type=jnp.float32)
    y_ref[...] = y

    @pl.when(i == 0)
    def _():
        s_ref[...] = jnp.zeros_like(s_ref)
        ss_ref[...] = jnp.zeros_like(ss_ref)

    # Sublane reductions go to the XLU (idle slot while the MXU is busy).
    s_ref[...] += jnp.sum(y, axis=0, keepdims=True)
    ss_ref[...] += jnp.sum(y * y, axis=0, keepdims=True)


def _bn_apply_kernel(y_ref, scale_ref, shift_ref, o_ref, *, relu):
    """Pass 2: y * scale + shift (+ ReLU).  scale/shift fold gamma, beta, mean, var."""
    y = y_ref[...] * scale_ref[...] + shift_ref[...]
    if relu:
        y = jnp.maximum(y, 0.0)
    o_ref[...] = y.astype(o_ref.dtype)


def _bn_add_relu_kernel(y_ref, sc2_ref, sh2_ref, r_ref, scr_ref, shr_ref, o_ref):
    """Fused block tail: BN2(conv2) + BN_sc(shortcut) (or identity) -> add -> ReLU."""
    y = y_ref[...] * sc2_ref[...] + sh2_ref[...]
    r = r_ref[...].astype(jnp.float32) * scr_ref[...] + shr_ref[...]
    o_ref[...] = jnp.maximum(y + r, 0.0).astype(o_ref.dtype)


# ------------------------- pallas_call wrappers ----------------------------- #

def _round_up(x, m):
    return (x + m - 1) // m * m


def _pad_rows(a, rows):
    if a.shape[0] == rows:
        return a
    return jnp.pad(a, ((0, rows - a.shape[0]), (0, 0)))


def _pad_cols(a, cols):
    if a.shape[-1] == cols:
        return a
    return jnp.pad(a, ((0, 0),) * (a.ndim - 1) + ((0, cols - a.shape[-1]),))


def _conv_stats(patches, w_pad, *, tm):
    """patches: (M_pad, K) bf16, w_pad: (K, Cpad) bf16 -> (y f32, sum, sumsq)."""
    m_pad, k = patches.shape
    cpad = w_pad.shape[1]
    grid = (m_pad // tm,)
    return pl.pallas_call(
        _conv_stats_kernel,
        grid=grid,
        in_specs=[
            pl.BlockSpec((tm, k), lambda i: (i, 0)),
            pl.BlockSpec((k, cpad), lambda i: (0, 0)),      # resident, DMA'd once
        ],
        out_specs=(
            pl.BlockSpec((tm, cpad), lambda i: (i, 0)),
            pl.BlockSpec((1, cpad), lambda i: (0, 0)),       # accumulator outputs
            pl.BlockSpec((1, cpad), lambda i: (0, 0)),
        ),
        out_shape=(
            jax.ShapeDtypeStruct((m_pad, cpad), jnp.float32),
            jax.ShapeDtypeStruct((1, cpad), jnp.float32),
            jax.ShapeDtypeStruct((1, cpad), jnp.float32),
        ),
        compiler_params=pltpu.CompilerParams(
            dimension_semantics=("arbitrary",),   # stats accumulate across M tiles
            vmem_limit_bytes=VMEM_LIMIT),
    )(patches, w_pad)


def _bn_apply(y, scale, shift, *, tm, relu, out_dtype):
    m_pad, cpad = y.shape
    grid = (m_pad // tm,)
    return pl.pallas_call(
        functools.partial(_bn_apply_kernel, relu=relu),
        grid=grid,
        in_specs=[
            pl.BlockSpec((tm, cpad), lambda i: (i, 0)),
            pl.BlockSpec((1, cpad), lambda i: (0, 0)),
            pl.BlockSpec((1, cpad), lambda i: (0, 0)),
        ],
        out_specs=pl.BlockSpec((tm, cpad), lambda i: (i, 0)),
        out_shape=jax.ShapeDtypeStruct((m_pad, cpad), out_dtype),
        compiler_params=pltpu.CompilerParams(
            dimension_semantics=("parallel",),
            vmem_limit_bytes=VMEM_LIMIT),
    )(y, scale, shift)


def _bn_add_relu(y, scale2, shift2, res, scale_r, shift_r, *, tm):
    m_pad, cpad = y.shape
    grid = (m_pad // tm,)
    return pl.pallas_call(
        _bn_add_relu_kernel,
        grid=grid,
        in_specs=[
            pl.BlockSpec((tm, cpad), lambda i: (i, 0)),
            pl.BlockSpec((1, cpad), lambda i: (0, 0)),
            pl.BlockSpec((1, cpad), lambda i: (0, 0)),
            pl.BlockSpec((tm, cpad), lambda i: (i, 0)),
            pl.BlockSpec((1, cpad), lambda i: (0, 0)),
            pl.BlockSpec((1, cpad), lambda i: (0, 0)),
        ],
        out_specs=pl.BlockSpec((tm, cpad), lambda i: (i, 0)),
        out_shape=jax.ShapeDtypeStruct((m_pad, cpad), jnp.float32),
        compiler_params=pltpu.CompilerParams(
            dimension_semantics=("parallel",),
            vmem_limit_bytes=VMEM_LIMIT),
    )(y, scale2, shift2, res, scale_r, shift_r)


def _bn_scale_shift(s, ss, m_real, gamma, beta, cpad):
    """Fold batch stats + affine params into per-channel scale/shift (f32, tiny)."""
    mean = s / m_real
    var = jnp.maximum(ss / m_real - mean * mean, 0.0)
    inv = jax.lax.rsqrt(var + EPS)
    g = _pad_cols(gamma.reshape(1, -1).astype(jnp.float32), cpad)  # padded ch: gamma=0
    b = _pad_cols(beta.reshape(1, -1).astype(jnp.float32), cpad)   # padded ch: beta=0
    scale = g * inv
    shift = b - mean * scale
    return scale, shift


# ------------------------------- glue (JAX) -------------------------------- #

def _im2col(x_nhwc, kh, kw, stride, padding):
    """x: (N,H,W,C) -> (N*OH*OW, kh*kw*C) with column order (kh, kw, C)."""
    n, h, w, c = x_nhwc.shape
    sh, sw = stride
    xp = jnp.pad(x_nhwc, ((0, 0), (padding, padding), (padding, padding), (0, 0)))
    oh = (h + 2 * padding - kh) // sh + 1
    ow = (w + 2 * padding - kw) // sw + 1
    cols = []
    for i in range(kh):
        for j in range(kw):
            cols.append(xp[:, i:i + oh * sh:sh, j:j + ow * sw:sw, :])
    patches = jnp.concatenate(cols, axis=-1)            # (N, OH, OW, kh*kw*C)
    return patches.reshape(n * oh * ow, kh * kw * c), (n, oh, ow)


def init_resblock_params(key, inchannel, outchannel):
    k1, k2, k3, k4, k5, k6, k7, k8, k9 = jax.random.split(key, 9)
    return {
        # conv weights in HWIO layout
        "w1": 0.1 * jax.random.normal(k1, (3, 3, inchannel, outchannel), jnp.float32),
        "w2": 0.1 * jax.random.normal(k2, (3, 3, outchannel, outchannel), jnp.float32),
        "wsc": 0.1 * jax.random.normal(k3, (1, 1, inchannel, outchannel), jnp.float32),
        # BatchNorm affine parameters (nontrivial, deterministic)
        "g1": 1.0 + 0.1 * jax.random.normal(k4, (outchannel,), jnp.float32),
        "b1": 0.1 * jax.random.normal(k5, (outchannel,), jnp.float32),
        "g2": 1.0 + 0.1 * jax.random.normal(k6, (outchannel,), jnp.float32),
        "b2": 0.1 * jax.random.normal(k7, (outchannel,), jnp.float32),
        "gsc": 1.0 + 0.1 * jax.random.normal(k8, (outchannel,), jnp.float32),
        "bsc": 0.1 * jax.random.normal(k9, (outchannel,), jnp.float32),
    }


def resblock_forward(x_nchw, params, stride, *, tm=TM_DEFAULT):
    """Pallas ResBlock forward. x: NCHW float32 -> NCHW float32."""
    x = jnp.transpose(x_nchw, (0, 2, 3, 1)).astype(jnp.float32)   # NHWC
    n, h, w, cin = x.shape
    cout = params["w1"].shape[-1]
    cpad = _round_up(cout, LANE)
    sh, sw = stride
    # matches PyTorch: `if stride[1] != 1 or inchannel != outchannel`
    need_shortcut = (sw != 1) or (cin != cout)

    # ---- conv1 (3x3, stride, pad=1): pass 1 = matmul tiles + BN statistics ----
    p1, (n_, oh, ow) = _im2col(x, 3, 3, stride, 1)
    m = n_ * oh * ow
    tm_ = min(tm, _round_up(m, 8))            # tile rows; multiple of 8 sublanes
    m_pad = _round_up(m, tm_)                 # zero rows contribute 0 to the stats

    p1 = _pad_rows(p1.astype(MXU_DTYPE), m_pad)
    w1 = _pad_cols(params["w1"].reshape(-1, cout), cpad).astype(MXU_DTYPE)
    y1, s1, ss1 = _conv_stats(p1, w1, tm=tm_)
    scale1, shift1 = _bn_scale_shift(s1, ss1, m, params["g1"], params["b1"], cpad)

    # ---- pass 2: BN1 + ReLU -> mid (stored bf16; it only feeds conv2's matmul) ----
    mid = _bn_apply(y1, scale1, shift1, tm=tm_, relu=True, out_dtype=MXU_DTYPE)

    # ---- shortcut branch ----
    if need_shortcut:
        # 1x1 conv, stride s, pad 0  ==  strided spatial subsample, then matmul
        xs = x[:, ::sh, ::sw, :][:, :oh, :ow, :].reshape(m, cin)
        xs = _pad_rows(xs.astype(MXU_DTYPE), m_pad)
        wsc = _pad_cols(params["wsc"].reshape(cin, cout), cpad).astype(MXU_DTYPE)
        ysc, s_sc, ss_sc = _conv_stats(xs, wsc, tm=tm_)
        scale_sc, shift_sc = _bn_scale_shift(s_sc, ss_sc, m, params["gsc"],
                                             params["bsc"], cpad)
        res = ysc
    else:
        # identity shortcut: residual is x itself, scale=1 / shift=0
        res = _pad_rows(_pad_cols(x.reshape(m, cin), cpad), m_pad)
        scale_sc = jnp.ones((1, cpad), jnp.float32)
        shift_sc = jnp.zeros((1, cpad), jnp.float32)

    # ---- conv2 (3x3, stride 1, pad=1): pass 1 = matmul tiles + BN statistics ----
    # slice mid back to the real channel count so conv2's K stays 9*cout
    mid_img = mid[:m, :cout].reshape(n_, oh, ow, cout)
    p2, _ = _im2col(mid_img, 3, 3, (1, 1), 1)
    p2 = _pad_rows(p2, m_pad)                                   # already bf16
    w2 = _pad_cols(params["w2"].reshape(-1, cout), cpad).astype(MXU_DTYPE)
    y2, s2, ss2 = _conv_stats(p2, w2, tm=tm_)
    scale2, shift2 = _bn_scale_shift(s2, ss2, m, params["g2"], params["b2"], cpad)

    # ---- fused tail: BN2 + BN_sc (or identity) + residual add + ReLU ----
    out = _bn_add_relu(y2, scale2, shift2, res, scale_sc, shift_sc, tm=tm_)
    out = out[:m, :cout].reshape(n_, oh, ow, cout)
    return jnp.transpose(out, (0, 3, 1, 2))                      # back to NCHW


# -------------------------- pure-JAX reference ------------------------------ #

def _ref_forward(x_nchw, params, stride):
    x = jnp.transpose(x_nchw, (0, 2, 3, 1)).astype(jnp.float32)
    cin = x.shape[-1]
    cout = params["w1"].shape[-1]
    need_shortcut = (stride[1] != 1) or (cin != cout)

    def conv(v, w, strides, pad):
        return jax.lax.conv_general_dilated(
            v, w, window_strides=strides, padding=[(pad, pad), (pad, pad)],
            dimension_numbers=("NHWC", "HWIO", "NHWC"))

    def bn(v, g, b):
        mean = jnp.mean(v, axis=(0, 1, 2), keepdims=True)
        var = jnp.mean((v - mean) ** 2, axis=(0, 1, 2), keepdims=True)
        return (v - mean) * jax.lax.rsqrt(var + EPS) * g.reshape(1, 1, 1, -1) \
            + b.reshape(1, 1, 1, -1)

    h = jax.nn.relu(bn(conv(x, params["w1"], stride, 1), params["g1"], params["b1"]))
    h = bn(conv(h, params["w2"], (1, 1), 1), params["g2"], params["b2"])
    if need_shortcut:
        s = bn(conv(x, params["wsc"], stride, 0), params["gsc"], params["bsc"])
    else:
        s = x
    out = jax.nn.relu(h + s)
    return jnp.transpose(out, (0, 3, 1, 2))


# ---------------------------------- main ----------------------------------- #

if __name__ == "__main__":
    key = jax.random.PRNGKey(0)
    k_x, k_p, k_x2, k_p2 = jax.random.split(key, 4)

    fwd = jax.jit(resblock_forward, static_argnames=("stride", "tm"))

    # Tolerance note: matmul operands are bf16 on the MXU (f32 accumulation / BN math),
    # the reference conv is pure f32 -> allow ~1-2% deviation.
    RTOL = ATOL = 2e-2

    # case 1: projection shortcut (stride 2, channel change)
    N, CIN, COUT, H, W = 2, 4, 8, 16, 16
    stride = (2, 2)
    x = jax.random.normal(k_x, (N, CIN, H, W), jnp.float32)
    params = init_resblock_params(k_p, CIN, COUT)
    out = jax.block_until_ready(fwd(x, params, stride=stride))
    ref = jax.block_until_ready(_ref_forward(x, params, stride))
    assert out.shape == (N, COUT, H // stride[0], W // stride[1]), out.shape
    np.testing.assert_allclose(np.asarray(out), np.asarray(ref), rtol=RTOL, atol=ATOL)

    # case 2: identity shortcut (stride 1, same channels)
    x2 = jax.random.normal(k_x2, (N, COUT, H, W), jnp.float32)
    params2 = init_resblock_params(k_p2, COUT, COUT)
    out2 = jax.block_until_ready(fwd(x2, params2, stride=(1, 1)))
    ref2 = jax.block_until_ready(_ref_forward(x2, params2, (1, 1)))
    assert out2.shape == (N, COUT, H, W), out2.shape
    np.testing.assert_allclose(np.asarray(out2), np.asarray(ref2), rtol=RTOL, atol=ATOL)

    print("KERNEL_OK")
</pallas_src>

<mosaic_0001>
module attributes {stable_mosaic.version = 11 : i64} {
  func.func @_conv_stats_kernel(%arg0: i32, %arg1: memref<128x4xbf16, #tpu.memory_space<vmem>>, %arg2: memref<4x128xbf16, #tpu.memory_space<vmem>>, %arg3: memref<128x128xf32, #tpu.memory_space<vmem>>, %arg4: memref<1x128xf32, #tpu.memory_space<vmem>>, %arg5: memref<1x128xf32, #tpu.memory_space<vmem>>) attributes {dimension_semantics = [#tpu.dimension_semantics<arbitrary>], iteration_bounds = array<i64: 1>, scalar_prefetch = 0 : i64, scratch_operands = 0 : i64, tpu.core_type = #tpu.core_type<tc>, window_params = [{transform_indices = @transform_0, window_bounds = array<i64: 128, 4>}, {pipeline_mode = #tpu.pipeline_mode<synchronous>, transform_indices = @transform_1, window_bounds = array<i64: 4, 128>}, {transform_indices = @transform_2, window_bounds = array<i64: 128, 128>}, {pipeline_mode = #tpu.pipeline_mode<synchronous>, transform_indices = @transform_3, window_bounds = array<i64: 1, 128>}, {pipeline_mode = #tpu.pipeline_mode<synchronous>, transform_indices = @transform_4, window_bounds = array<i64: 1, 128>}]} {
    %c0 = arith.constant 0 : index
    %c0_0 = arith.constant 0 : index
    %0 = vector.load %arg1[%c0, %c0_0] : memref<128x4xbf16, #tpu.memory_space<vmem>>, vector<128x4xbf16>
    %c0_1 = arith.constant 0 : index
    %c0_2 = arith.constant 0 : index
    %1 = vector.load %arg2[%c0_1, %c0_2] : memref<4x128xbf16, #tpu.memory_space<vmem>>, vector<4x128xbf16>
    %cst = arith.constant dense<0.000000e+00> : vector<128x128xf32>
    %2 = tpu.matmul %0, %1, %cst {dimension_numbers = #tpu.dot_dimension_numbers<[1], [0], [0], [1], [0, 0, 1, 1], [], []>} : vector<128x4xbf16>, vector<4x128xbf16>, vector<128x128xf32> -> vector<128x128xf32>
    %c0_3 = arith.constant 0 : index
    %c0_4 = arith.constant 0 : index
    %3 = vector.load %arg3[%c0_3, %c0_4] : memref<128x128xf32, #tpu.memory_space<vmem>>, vector<128x128xf32>
    tpu.vector_store %arg3[%c0_3, %c0_4], %2 {strides = array<i32>} : memref<128x128xf32, #tpu.memory_space<vmem>>, vector<128x128xf32>,
    %c0_i32 = arith.constant 0 : i32
    %4 = arith.cmpi eq, %arg0, %c0_i32 : i32
    %5 = arith.extui %4 : i1 to i32
    %c0_i32_5 = arith.constant 0 : i32
    %6 = arith.cmpi ne, %5, %c0_i32_5 : i32
    scf.if %6 {
      %cst_16 = arith.constant 0.000000e+00 : f32
      %18 = vector.broadcast %cst_16 : f32 to vector<1x128xf32>
      %c0_17 = arith.constant 0 : index
      %c0_18 = arith.constant 0 : index
      %19 = vector.load %arg4[%c0_17, %c0_18] : memref<1x128xf32, #tpu.memory_space<vmem>>, vector<1x128xf32>
      tpu.vector_store %arg4[%c0_17, %c0_18], %18 {strides = array<i32>} : memref<1x128xf32, #tpu.memory_space<vmem>>, vector<1x128xf32>,
      %cst_19 = arith.constant 0.000000e+00 : f32
      %20 = vector.broadcast %cst_19 : f32 to vector<1x128xf32>
      %c0_20 = arith.constant 0 : index
      %c0_21 = arith.constant 0 : index
      %21 = vector.load %arg5[%c0_20, %c0_21] : memref<1x128xf32, #tpu.memory_space<vmem>>, vector<1x128xf32>
      tpu.vector_store %arg5[%c0_20, %c0_21], %20 {strides = array<i32>} : memref<1x128xf32, #tpu.memory_space<vmem>>, vector<1x128xf32>,
    } else {
    }
    %c0_6 = arith.constant 0 : index
    %c0_7 = arith.constant 0 : index
    %7 = vector.load %arg4[%c0_6, %c0_7] : memref<1x128xf32, #tpu.memory_space<vmem>>, vector<1x128xf32>
    %cst_8 = arith.constant dense<0.000000e+00> : vector<128xf32>
    %8 = vector.multi_reduction <add>, %2, %cst_8 [0] : vector<128x128xf32> to vector<128xf32>
    %9 = vector.shape_cast %8 : vector<128xf32> to vector<1x128xf32>
    %10 = arith.addf %7, %9 : vector<1x128xf32>
    %c0_9 = arith.constant 0 : index
    %c0_10 = arith.constant 0 : index
    %11 = vector.load %arg4[%c0_9, %c0_10] : memref<1x128xf32, #tpu.memory_space<vmem>>, vector<1x128xf32>
    tpu.vector_store %arg4[%c0_9, %c0_10], %10 {strides = array<i32>} : memref<1x128xf32, #tpu.memory_space<vmem>>, vector<1x128xf32>,
    %c0_11 = arith.constant 0 : index
    %c0_12 = arith.constant 0 : index
    %12 = vector.load %arg5[%c0_11, %c0_12] : memref<1x128xf32, #tpu.memory_space<vmem>>, vector<1x128xf32>
    %13 = arith.mulf %2, %2 : vector<128x128xf32>
    %cst_13 = arith.constant dense<0.000000e+00> : vector<128xf32>
    %14 = vector.multi_reduction <add>, %13, %cst_13 [0] : vector<128x128xf32> to vector<128xf32>
    %15 = vector.shape_cast %14 : vector<128xf32> to vector<1x128xf32>
    %16 = arith.addf %12, %15 : vector<1x128xf32>
    %c0_14 = arith.constant 0 : index
    %c0_15 = arith.constant 0 : index
    %17 = vector.load %arg5[%c0_14, %c0_15] : memref<1x128xf32, #tpu.memory_space<vmem>>, vector<1x128xf32>
    tpu.vector_store %arg5[%c0_14, %c0_15], %16 {strides = array<i32>} : memref<1x128xf32, #tpu.memory_space<vmem>>, vector<1x128xf32>,
    return
  }
  func.func @transform_0(%arg0: i32) -> (i32, i32) {
    %c0_i32 = arith.constant 0 : i32
    %c0_i32_0 = arith.constant 0 : i32
    return %arg0, %c0_i32 : i32, i32
  }
  func.func @transform_1(%arg0: i32) -> (i32, i32) {
    %c0_i32 = arith.constant 0 : i32
    %c0_i32_0 = arith.constant 0 : i32
    %c0_i32_1 = arith.constant 0 : i32
    return %c0_i32, %c0_i32_0 : i32, i32
  }
  func.func @transform_2(%arg0: i32) -> (i32, i32) {
    %c0_i32 = arith.constant 0 : i32
    %c0_i32_0 = arith.constant 0 : i32
    return %arg0, %c0_i32 : i32, i32
  }
  func.func @transform_3(%arg0: i32) -> (i32, i32) {
    %c0_i32 = arith.constant 0 : i32
    %c0_i32_0 = arith.constant 0 : i32
    %c0_i32_1 = arith.constant 0 : i32
    return %c0_i32, %c0_i32_0 : i32, i32
  }
  func.func @transform_4(%arg0: i32) -> (i32, i32) {
    %c0_i32 = arith.constant 0 : i32
    %c0_i32_0 = arith.constant 0 : i32
    %c0_i32_1 = arith.constant 0 : i32
    return %c0_i32, %c0_i32_0 : i32, i32
  }
}

module attributes {stable_mosaic.version = 11 : i64} {
  func.func @_conv_stats_kernel(%arg0: i32, %arg1: memref<128x36xbf16, #tpu.memory_space<vmem>>, %arg2: memref<36x128xbf16, #tpu.memory_space<vmem>>, %arg3: memref<128x128xf32, #tpu.memory_space<vmem>>, %arg4: memref<1x128xf32, #tpu.memory_space<vmem>>, %arg5: memref<1x128xf32, #tpu.memory_space<vmem>>) attributes {dimension_semantics = [#tpu.dimension_semantics<arbitrary>], iteration_bounds = array<i64: 1>, scalar_prefetch = 0 : i64, scratch_operands = 0 : i64, tpu.core_type = #tpu.core_type<tc>, window_params = [{transform_indices = @transform_0, window_bounds = array<i64: 128, 36>}, {pipeline_mode = #tpu.pipeline_mode<synchronous>, transform_indices = @transform_1, window_bounds = array<i64: 36, 128>}, {transform_indices = @transform_2, window_bounds = array<i64: 128, 128>}, {pipeline_mode = #tpu.pipeline_mode<synchronous>, transform_indices = @transform_3, window_bounds = array<i64: 1, 128>}, {pipeline_mode = #tpu.pipeline_mode<synchronous>, transform_indices = @transform_4, window_bounds = array<i64: 1, 128>}]} {
    %c0 = arith.constant 0 : index
    %c0_0 = arith.constant 0 : index
    %0 = vector.load %arg1[%c0, %c0_0] : memref<128x36xbf16, #tpu.memory_space<vmem>>, vector<128x36xbf16>
    %c0_1 = arith.constant 0 : index
    %c0_2 = arith.constant 0 : index
    %1 = vector.load %arg2[%c0_1, %c0_2] : memref<36x128xbf16, #tpu.memory_space<vmem>>, vector<36x128xbf16>
    %cst = arith.constant dense<0.000000e+00> : vector<128x128xf32>
    %2 = tpu.matmul %0, %1, %cst {dimension_numbers = #tpu.dot_dimension_numbers<[1], [0], [0], [1], [0, 0, 1, 1], [], []>} : vector<128x36xbf16>, vector<36x128xbf16>, vector<128x128xf32> -> vector<128x128xf32>
    %c0_3 = arith.constant 0 : index
    %c0_4 = arith.constant 0 : index
    %3 = vector.load %arg3[%c0_3, %c0_4] : memref<128x128xf32, #tpu.memory_space<vmem>>, vector<128x128xf32>
    tpu.vector_store %arg3[%c0_3, %c0_4], %2 {strides = array<i32>} : memref<128x128xf32, #tpu.memory_space<vmem>>, vector<128x128xf32>,
    %c0_i32 = arith.constant 0 : i32
    %4 = arith.cmpi eq, %arg0, %c0_i32 : i32
    %5 = arith.extui %4 : i1 to i32
    %c0_i32_5 = arith.constant 0 : i32
    %6 = arith.cmpi ne, %5, %c0_i32_5 : i32
    scf.if %6 {
      %cst_16 = arith.constant 0.000000e+00 : f32
      %18 = vector.broadcast %cst_16 : f32 to vector<1x128xf32>
      %c0_17 = arith.constant 0 : index
      %c0_18 = arith.constant 0 : index
      %19 = vector.load %arg4[%c0_17, %c0_18] : memref<1x128xf32, #tpu.memory_space<vmem>>, vector<1x128xf32>
      tpu.vector_store %arg4[%c0_17, %c0_18], %18 {strides = array<i32>} : memref<1x128xf32, #tpu.memory_space<vmem>>, vector<1x128xf32>,
      %cst_19 = arith.constant 0.000000e+00 : f32
      %20 = vector.broadcast %cst_19 : f32 to vector<1x128xf32>
      %c0_20 = arith.constant 0 : index
      %c0_21 = arith.constant 0 : index
      %21 = vector.load %arg5[%c0_20, %c0_21] : memref<1x128xf32, #tpu.memory_space<vmem>>, vector<1x128xf32>
      tpu.vector_store %arg5[%c0_20, %c0_21], %20 {strides = array<i32>} : memref<1x128xf32, #tpu.memory_space<vmem>>, vector<1x128xf32>,
    } else {
    }
    %c0_6 = arith.constant 0 : index
    %c0_7 = arith.constant 0 : index
    %7 = vector.load %arg4[%c0_6, %c0_7] : memref<1x128xf32, #tpu.memory_space<vmem>>, vector<1x128xf32>
    %cst_8 = arith.constant dense<0.000000e+00> : vector<128xf32>
    %8 = vector.multi_reduction <add>, %2, %cst_8 [0] : vector<128x128xf32> to vector<128xf32>
    %9 = vector.shape_cast %8 : vector<128xf32> to vector<1x128xf32>
    %10 = arith.addf %7, %9 : vector<1x128xf32>
    %c0_9 = arith.constant 0 : index
    %c0_10 = arith.constant 0 : index
    %11 = vector.load %arg4[%c0_9, %c0_10] : memref<1x128xf32, #tpu.memory_space<vmem>>, vector<1x128xf32>
    tpu.vector_store %arg4[%c0_9, %c0_10], %10 {strides = array<i32>} : memref<1x128xf32, #tpu.memory_space<vmem>>, vector<1x128xf32>,
    %c0_11 = arith.constant 0 : index
    %c0_12 = arith.constant 0 : index
    %12 = vector.load %arg5[%c0_11, %c0_12] : memref<1x128xf32, #tpu.memory_space<vmem>>, vector<1x128xf32>
    %13 = arith.mulf %2, %2 : vector<128x128xf32>
    %cst_13 = arith.constant dense<0.000000e+00> : vector<128xf32>
    %14 = vector.multi_reduction <add>, %13, %cst_13 [0] : vector<128x128xf32> to vector<128xf32>
    %15 = vector.shape_cast %14 : vector<128xf32> to vector<1x128xf32>
    %16 = arith.addf %12, %15 : vector<1x128xf32>
    %c0_14 = arith.constant 0 : index
    %c0_15 = arith.constant 0 : index
    %17 = vector.load %arg5[%c0_14, %c0_15] : memref<1x128xf32, #tpu.memory_space<vmem>>, vector<1x128xf32>
    tpu.vector_store %arg5[%c0_14, %c0_15], %16 {strides = array<i32>} : memref<1x128xf32, #tpu.memory_space<vmem>>, vector<1x128xf32>,
    return
  }
  func.func @transform_0(%arg0: i32) -> (i32, i32) {
    %c0_i32 = arith.constant 0 : i32
    %c0_i32_0 = arith.constant 0 : i32
    return %arg0, %c0_i32 : i32, i32
  }
  func.func @transform_1(%arg0: i32) -> (i32, i32) {
    %c0_i32 = arith.constant 0 : i32
    %c0_i32_0 = arith.constant 0 : i32
    %c0_i32_1 = arith.constant 0 : i32
    return %c0_i32, %c0_i32_0 : i32, i32
  }
  func.func @transform_2(%arg0: i32) -> (i32, i32) {
    %c0_i32 = arith.constant 0 : i32
    %c0_i32_0 = arith.constant 0 : i32
    return %arg0, %c0_i32 : i32, i32
  }
  func.func @transform_3(%arg0: i32) -> (i32, i32) {
    %c0_i32 = arith.constant 0 : i32
    %c0_i32_0 = arith.constant 0 : i32
    %c0_i32_1 = arith.constant 0 : i32
    return %c0_i32, %c0_i32_0 : i32, i32
  }
  func.func @transform_4(%arg0: i32) -> (i32, i32) {
    %c0_i32 = arith.constant 0 : i32
    %c0_i32_0 = arith.constant 0 : i32
    %c0_i32_1 = arith.constant 0 : i32
    return %c0_i32, %c0_i32_0 : i32, i32
  }
}

module attributes {stable_mosaic.version = 11 : i64} {
  func.func @_bn_apply_kernel(%arg0: i32, %arg1: memref<128x128xf32, #tpu.memory_space<vmem>>, %arg2: memref<1x128xf32, #tpu.memory_space<vmem>>, %arg3: memref<1x128xf32, #tpu.memory_space<vmem>>, %arg4: memref<128x128xbf16, #tpu.memory_space<vmem>>) attributes {dimension_semantics = [#tpu.dimension_semantics<parallel>], iteration_bounds = array<i64: 1>, scalar_prefetch = 0 : i64, scratch_operands = 0 : i64, tpu.core_type = #tpu.core_type<tc>, window_params = [{transform_indices = @transform_0, window_bounds = array<i64: 128, 128>}, {pipeline_mode = #tpu.pipeline_mode<synchronous>, transform_indices = @transform_1, window_bounds = array<i64: 1, 128>}, {pipeline_mode = #tpu.pipeline_mode<synchronous>, transform_indices = @transform_2, window_bounds = array<i64: 1, 128>}, {transform_indices = @transform_3, window_bounds = array<i64: 128, 128>}]} {
    %c0 = arith.constant 0 : index
    %c0_0 = arith.constant 0 : index
    %0 = vector.load %arg1[%c0, %c0_0] : memref<128x128xf32, #tpu.memory_space<vmem>>, vector<128x128xf32>
    %c0_1 = arith.constant 0 : index
    %c0_2 = arith.constant 0 : index
    %1 = vector.load %arg2[%c0_1, %c0_2] : memref<1x128xf32, #tpu.memory_space<vmem>>, vector<1x128xf32>
    %2 = vector.broadcast %1 : vector<1x128xf32> to vector<128x128xf32>
    %3 = arith.mulf %0, %2 : vector<128x128xf32>
    %c0_3 = arith.constant 0 : index
    %c0_4 = arith.constant 0 : index
    %4 = vector.load %arg3[%c0_3, %c0_4] : memref<1x128xf32, #tpu.memory_space<vmem>>, vector<1x128xf32>
    %5 = vector.broadcast %4 : vector<1x128xf32> to vector<128x128xf32>
    %6 = arith.addf %3, %5 : vector<128x128xf32>
    %cst = arith.constant 0.000000e+00 : f32
    %7 = vector.broadcast %cst : f32 to vector<128x128xf32>
    %8 = arith.maximumf %6, %7 : vector<128x128xf32>
    %9 = arith.truncf %8 : vector<128x128xf32> to vector<128x128xbf16>
    %c0_5 = arith.constant 0 : index
    %c0_6 = arith.constant 0 : index
    %10 = vector.load %arg4[%c0_5, %c0_6] : memref<128x128xbf16, #tpu.memory_space<vmem>>, vector<128x128xbf16>
    tpu.vector_store %arg4[%c0_5, %c0_6], %9 {strides = array<i32>} : memref<128x128xbf16, #tpu.memory_space<vmem>>, vector<128x128xbf16>,
    return
  }
  func.func @transform_0(%arg0: i32) -> (i32, i32) {
    %c0_i32 = arith.constant 0 : i32
    %c0_i32_0 = arith.constant 0 : i32
    return %arg0, %c0_i32 : i32, i32
  }
  func.func @transform_1(%arg0: i32) -> (i32, i32) {
    %c0_i32 = arith.constant 0 : i32
    %c0_i32_0 = arith.constant 0 : i32
    %c0_i32_1 = arith.constant 0 : i32
    return %c0_i32, %c0_i32_0 : i32, i32
  }
  func.func @transform_2(%arg0: i32) -> (i32, i32) {
    %c0_i32 = arith.constant 0 : i32
    %c0_i32_0 = arith.constant 0 : i32
    %c0_i32_1 = arith.constant 0 : i32
    return %c0_i32, %c0_i32_0 : i32, i32
  }
  func.func @transform_3(%arg0: i32) -> (i32, i32) {
    %c0_i32 = arith.constant 0 : i32
    %c0_i32_0 = arith.constant 0 : i32
    return %arg0, %c0_i32 : i32, i32
  }
}

module attributes {stable_mosaic.version = 11 : i64} {
  func.func @_conv_stats_kernel(%arg0: i32, %arg1: memref<128x72xbf16, #tpu.memory_space<vmem>>, %arg2: memref<72x128xbf16, #tpu.memory_space<vmem>>, %arg3: memref<128x128xf32, #tpu.memory_space<vmem>>, %arg4: memref<1x128xf32, #tpu.memory_space<vmem>>, %arg5: memref<1x128xf32, #tpu.memory_space<vmem>>) attributes {dimension_semantics = [#tpu.dimension_semantics<arbitrary>], iteration_bounds = array<i64: 1>, scalar_prefetch = 0 : i64, scratch_operands = 0 : i64, tpu.core_type = #tpu.core_type<tc>, window_params = [{transform_indices = @transform_0, window_bounds = array<i64: 128, 72>}, {pipeline_mode = #tpu.pipeline_mode<synchronous>, transform_indices = @transform_1, window_bounds = array<i64: 72, 128>}, {transform_indices = @transform_2, window_bounds = array<i64: 128, 128>}, {pipeline_mode = #tpu.pipeline_mode<synchronous>, transform_indices = @transform_3, window_bounds = array<i64: 1, 128>}, {pipeline_mode = #tpu.pipeline_mode<synchronous>, transform_indices = @transform_4, window_bounds = array<i64: 1, 128>}]} {
    %c0 = arith.constant 0 : index
    %c0_0 = arith.constant 0 : index
    %0 = vector.load %arg1[%c0, %c0_0] : memref<128x72xbf16, #tpu.memory_space<vmem>>, vector<128x72xbf16>
    %c0_1 = arith.constant 0 : index
    %c0_2 = arith.constant 0 : index
    %1 = vector.load %arg2[%c0_1, %c0_2] : memref<72x128xbf16, #tpu.memory_space<vmem>>, vector<72x128xbf16>
    %cst = arith.constant dense<0.000000e+00> : vector<128x128xf32>
    %2 = tpu.matmul %0, %1, %cst {dimension_numbers = #tpu.dot_dimension_numbers<[1], [0], [0], [1], [0, 0, 1, 1], [], []>} : vector<128x72xbf16>, vector<72x128xbf16>, vector<128x128xf32> -> vector<128x128xf32>
    %c0_3 = arith.constant 0 : index
    %c0_4 = arith.constant 0 : index
    %3 = vector.load %arg3[%c0_3, %c0_4] : memref<128x128xf32, #tpu.memory_space<vmem>>, vector<128x128xf32>
    tpu.vector_store %arg3[%c0_3, %c0_4], %2 {strides = array<i32>} : memref<128x128xf32, #tpu.memory_space<vmem>>, vector<128x128xf32>,
    %c0_i32 = arith.constant 0 : i32
    %4 = arith.cmpi eq, %arg0, %c0_i32 : i32
    %5 = arith.extui %4 : i1 to i32
    %c0_i32_5 = arith.constant 0 : i32
    %6 = arith.cmpi ne, %5, %c0_i32_5 : i32
    scf.if %6 {
      %cst_16 = arith.constant 0.000000e+00 : f32
      %18 = vector.broadcast %cst_16 : f32 to vector<1x128xf32>
      %c0_17 = arith.constant 0 : index
      %c0_18 = arith.constant 0 : index
      %19 = vector.load %arg4[%c0_17, %c0_18] : memref<1x128xf32, #tpu.memory_space<vmem>>, vector<1x128xf32>
      tpu.vector_store %arg4[%c0_17, %c0_18], %18 {strides = array<i32>} : memref<1x128xf32, #tpu.memory_space<vmem>>, vector<1x128xf32>,
      %cst_19 = arith.constant 0.000000e+00 : f32
      %20 = vector.broadcast %cst_19 : f32 to vector<1x128xf32>
      %c0_20 = arith.constant 0 : index
      %c0_21 = arith.constant 0 : index
      %21 = vector.load %arg5[%c0_20, %c0_21] : memref<1x128xf32, #tpu.memory_space<vmem>>, vector<1x128xf32>
      tpu.vector_store %arg5[%c0_20, %c0_21], %20 {strides = array<i32>} : memref<1x128xf32, #tpu.memory_space<vmem>>, vector<1x128xf32>,
    } else {
    }
    %c0_6 = arith.constant 0 : index
    %c0_7 = arith.constant 0 : index
    %7 = vector.load %arg4[%c0_6, %c0_7] : memref<1x128xf32, #tpu.memory_space<vmem>>, vector<1x128xf32>
    %cst_8 = arith.constant dense<0.000000e+00> : vector<128xf32>
    %8 = vector.multi_reduction <add>, %2, %cst_8 [0] : vector<128x128xf32> to vector<128xf32>
    %9 = vector.shape_cast %8 : vector<128xf32> to vector<1x128xf32>
    %10 = arith.addf %7, %9 : vector<1x128xf32>
    %c0_9 = arith.constant 0 : index
    %c0_10 = arith.constant 0 : index
    %11 = vector.load %arg4[%c0_9, %c0_10] : memref<1x128xf32, #tpu.memory_space<vmem>>, vector<1x128xf32>
    tpu.vector_store %arg4[%c0_9, %c0_10], %10 {strides = array<i32>} : memref<1x128xf32, #tpu.memory_space<vmem>>, vector<1x128xf32>,
    %c0_11 = arith.constant 0 : index
    %c0_12 = arith.constant 0 : index
    %12 = vector.load %arg5[%c0_11, %c0_12] : memref<1x128xf32, #tpu.memory_space<vmem>>, vector<1x128xf32>
    %13 = arith.mulf %2, %2 : vector<128x128xf32>
    %cst_13 = arith.constant dense<0.000000e+00> : vector<128xf32>
    %14 = vector.multi_reduction <add>, %13, %cst_13 [0] : vector<128x128xf32> to vector<128xf32>
    %15 = vector.shape_cast %14 : vector<128xf32> to vector<1x128xf32>
    %16 = arith.addf %12, %15 : vector<1x128xf32>
    %c0_14 = arith.constant 0 : index
    %c0_15 = arith.constant 0 : index
    %17 = vector.load %arg5[%c0_14, %c0_15] : memref<1x128xf32, #tpu.memory_space<vmem>>, vector<1x128xf32>
    tpu.vector_store %arg5[%c0_14, %c0_15], %16 {strides = array<i32>} : memref<1x128xf32, #tpu.memory_space<vmem>>, vector<1x128xf32>,
    return
  }
  func.func @transform_0(%arg0: i32) -> (i32, i32) {
    %c0_i32 = arith.constant 0 : i32
    %c0_i32_0 = arith.constant 0 : i32
    return %arg0, %c0_i32 : i32, i32
  }
  func.func @transform_1(%arg0: i32) -> (i32, i32) {
    %c0_i32 = arith.constant 0 : i32
    %c0_i32_0 = arith.constant 0 : i32
    %c0_i32_1 = arith.constant 0 : i32
    return %c0_i32, %c0_i32_0 : i32, i32
  }
  func.func @transform_2(%arg0: i32) -> (i32, i32) {
    %c0_i32 = arith.constant 0 : i32
    %c0_i32_0 = arith.constant 0 : i32
    return %arg0, %c0_i32 : i32, i32
  }
  func.func @transform_3(%arg0: i32) -> (i32, i32) {
    %c0_i32 = arith.constant 0 : i32
    %c0_i32_0 = arith.constant 0 : i32
    %c0_i32_1 = arith.constant 0 : i32
    return %c0_i32, %c0_i32_0 : i32, i32
  }
  func.func @transform_4(%arg0: i32) -> (i32, i32) {
    %c0_i32 = arith.constant 0 : i32
    %c0_i32_0 = arith.constant 0 : i32
    %c0_i32_1 = arith.constant 0 : i32
    return %c0_i32, %c0_i32_0 : i32, i32
  }
}

module attributes {stable_mosaic.version = 11 : i64} {
  func.func @_bn_add_relu_kernel(%arg0: i32, %arg1: memref<128x128xf32, #tpu.memory_space<vmem>>, %arg2: memref<1x128xf32, #tpu.memory_space<vmem>>, %arg3: memref<1x128xf32, #tpu.memory_space<vmem>>, %arg4: memref<128x128xf32, #tpu.memory_space<vmem>>, %arg5: memref<1x128xf32, #tpu.memory_space<vmem>>, %arg6: memref<1x128xf32, #tpu.memory_space<vmem>>, %arg7: memref<128x128xf32, #tpu.memory_space<vmem>>) attributes {dimension_semantics = [#tpu.dimension_semantics<parallel>], iteration_bounds = array<i64: 1>, scalar_prefetch = 0 : i64, scratch_operands = 0 : i64, tpu.core_type = #tpu.core_type<tc>, window_params = [{transform_indices = @transform_0, window_bounds = array<i64: 128, 128>}, {pipeline_mode = #tpu.pipeline_mode<synchronous>, transform_indices = @transform_1, window_bounds = array<i64: 1, 128>}, {pipeline_mode = #tpu.pipeline_mode<synchronous>, transform_indices = @transform_2, window_bounds = array<i64: 1, 128>}, {transform_indices = @transform_3, window_bounds = array<i64: 128, 128>}, {pipeline_mode = #tpu.pipeline_mode<synchronous>, transform_indices = @transform_4, window_bounds = array<i64: 1, 128>}, {pipeline_mode = #tpu.pipeline_mode<synchronous>, transform_indices = @transform_5, window_bounds = array<i64: 1, 128>}, {transform_indices = @transform_6, window_bounds = array<i64: 128, 128>}]} {
    %c0 = arith.constant 0 : index
    %c0_0 = arith.constant 0 : index
    %0 = vector.load %arg1[%c0, %c0_0] : memref<128x128xf32, #tpu.memory_space<vmem>>, vector<128x128xf32>
    %c0_1 = arith.constant 0 : index
    %c0_2 = arith.constant 0 : index
    %1 = vector.load %arg2[%c0_1, %c0_2] : memref<1x128xf32, #tpu.memory_space<vmem>>, vector<1x128xf32>
    %2 = vector.broadcast %1 : vector<1x128xf32> to vector<128x128xf32>
    %3 = arith.mulf %0, %2 : vector<128x128xf32>
    %c0_3 = arith.constant 0 : index
    %c0_4 = arith.constant 0 : index
    %4 = vector.load %arg3[%c0_3, %c0_4] : memref<1x128xf32, #tpu.memory_space<vmem>>, vector<1x128xf32>
    %5 = vector.broadcast %4 : vector<1x128xf32> to vector<128x128xf32>
    %6 = arith.addf %3, %5 : vector<128x128xf32>
    %c0_5 = arith.constant 0 : index
    %c0_6 = arith.constant 0 : index
    %7 = vector.load %arg4[%c0_5, %c0_6] : memref<128x128xf32, #tpu.memory_space<vmem>>, vector<128x128xf32>
    %c0_7 = arith.constant 0 : index
    %c0_8 = arith.constant 0 : index
    %8 = vector.load %arg5[%c0_7, %c0_8] : memref<1x128xf32, #tpu.memory_space<vmem>>, vector<1x128xf32>
    %9 = vector.broadcast %8 : vector<1x128xf32> to vector<128x128xf32>
    %10 = arith.mulf %7, %9 : vector<128x128xf32>
    %c0_9 = arith.constant 0 : index
    %c0_10 = arith.constant 0 : index
    %11 = vector.load %arg6[%c0_9, %c0_10] : memref<1x128xf32, #tpu.memory_space<vmem>>, vector<1x128xf32>
    %12 = vector.broadcast %11 : vector<1x128xf32> to vector<128x128xf32>
    %13 = arith.addf %10, %12 : vector<128x128xf32>
    %14 = arith.addf %6, %13 : vector<128x128xf32>
    %cst = arith.constant 0.000000e+00 : f32
    %15 = vector.broadcast %cst : f32 to vector<128x128xf32>
    %16 = arith.maximumf %14, %15 : vector<128x128xf32>
    %c0_11 = arith.constant 0 : index
    %c0_12 = arith.constant 0 : index
    %17 = vector.load %arg7[%c0_11, %c0_12] : memref<128x128xf32, #tpu.memory_space<vmem>>, vector<128x128xf32>
    tpu.vector_store %arg7[%c0_11, %c0_12], %16 {strides = array<i32>} : memref<128x128xf32, #tpu.memory_space<vmem>>, vector<128x128xf32>,
    return
  }
  func.func @transform_0(%arg0: i32) -> (i32, i32) {
    %c0_i32 = arith.constant 0 : i32
    %c0_i32_0 = arith.constant 0 : i32
    return %arg0, %c0_i32 : i32, i32
  }
  func.func @transform_1(%arg0: i32) -> (i32, i32) {
    %c0_i32 = arith.constant 0 : i32
    %c0_i32_0 = arith.constant 0 : i32
    %c0_i32_1 = arith.constant 0 : i32
    return %c0_i32, %c0_i32_0 : i32, i32
  }
  func.func @transform_2(%arg0: i32) -> (i32, i32) {
    %c0_i32 = arith.constant 0 : i32
    %c0_i32_0 = arith.constant 0 : i32
    %c0_i32_1 = arith.constant 0 : i32
    return %c0_i32, %c0_i32_0 : i32, i32
  }
  func.func @transform_3(%arg0: i32) -> (i32, i32) {
    %c0_i32 = arith.constant 0 : i32
    %c0_i32_0 = arith.constant 0 : i32
    return %arg0, %c0_i32 : i32, i32
  }
  func.func @transform_4(%arg0: i32) -> (i32, i32) {
    %c0_i32 = arith.constant 0 : i32
    %c0_i32_0 = arith.constant 0 : i32
    %c0_i32_1 = arith.constant 0 : i32
    return %c0_i32, %c0_i32_0 : i32, i32
  }
  func.func @transform_5(%arg0: i32) -> (i32, i32) {
    %c0_i32 = arith.constant 0 : i32
    %c0_i32_0 = arith.constant 0 : i32
    %c0_i32_1 = arith.constant 0 : i32
    return %c0_i32, %c0_i32_0 : i32, i32
  }
  func.func @transform_6(%arg0: i32) -> (i32, i32) {
    %c0_i32 = arith.constant 0 : i32
    %c0_i32_0 = arith.constant 0 : i32
    return %arg0, %c0_i32 : i32, i32
  }
}

</mosaic_0001>

<bundles_post_ra>
// kernel: resblock_forward.7
= control target key start
LH: loop header
LB: loop body
LE: loop exit
PB: predicated region body
PF: predicated region fallthrough
CT: control target
= control target key end

     0   :  { %vm97_vm0 = vcmask 1041408   ;;  %vm72_vm1 = vcmask 31744   ;;  %v300_v21 = vmov 0.0   ;;  %s433_s1 = inlined_call_operand.vmem [shape: bf16[4,128], index: 1, kind: input, shape index: {}]   ;;  %s434_s0 = inlined_call_operand.vmem [shape: bf16[128,4], index: 0, kind: input, shape index: {}]   ;;  %s435_s2 = inlined_call_operand.vmem [shape: f32[128,128], index: 2, kind: output, shape index: {0}]   ;;  %s436_s3 = inlined_call_operand.vmem [shape: f32[1,128], index: 3, kind: output, shape index: {1}]   ;;  %s437_s4 = inlined_call_operand.vmem [shape: f32[1,128], index: 4, kind: output, shape index: {2}]  }
   0x1   :  { %v31_v0 = vld [vmem:[%s433_s1] sm:$0x3]  ;;  %v290_v3 = vld [vmem:[%s434_s0 + $0x10] sm:$0xff]  ;;  %v289_v6 = vld [vmem:[%s434_s0 + $0x8] sm:$0xff]  ;;  %170 = vst [vmem:[%s436_s3] sm:$0x1] %v300_v21 }
   0x2   :  { %v99_v1 = vsel %vm97_vm0, %v31_v0, 0  ;;  %v288_v2 = vld [vmem:[%s434_s0] sm:$0xff]  ;;  %v294_v5 = vld [vmem:[%s434_s0 + $0x30] sm:$0xff]  ;;  %v291_v7 = vld [vmem:[%s434_s0 + $0x18] sm:$0xff]  ;;  %171 = vst [vmem:[%s437_s4] sm:$0x1] %v300_v21 }
   0x3   :  { %108 = vmatpush.bf16.msra.mxu0 %v99_v1  ;;  %296 = vmatpush.bf16.msra.mxu1 %v99_v1  ;;  %v292_v4 = vld [vmem:[%s434_s0 + $0x20] sm:$0xff]  ;;  %v293_v8 = vld [vmem:[%s434_s0 + $0x28] sm:$0xff]  ;;  %v295_v9 = vld [vmem:[%s434_s0 + $0x38] sm:$0xff] }
   0x4   :  { %297 = vmatpush.bf16.msra.mxu2 %v99_v1  ;;  %298 = vmatpush.bf16.msra.mxu3 %v99_v1 }
   0x6   :  { %280 = vmatmul.msk.bf16.vlgmr.msra.gmra.mxu0 %vm72_vm1, %v288_v2  ;;  %282 = vmatmul.msk.bf16.vlgmr.msra.gmra.mxu1 %vm72_vm1, %v290_v3 }
   0x7   :  { %284 = vmatmul.msk.bf16.vlgmr.msra.gmra.mxu2 %vm72_vm1, %v292_v4  ;;  %286 = vmatmul.msk.bf16.vlgmr.msra.gmra.mxu3 %vm72_vm1, %v294_v5 }
   0x9   :  { %v196_v21 = vld [vmem:[%s437_s4] sm:$0x1] }
  0x16   :  { %281 = vmatmul.msk.bf16.gmra.mxu0 %vm72_vm1, %v289_v6  ;;  %283 = vmatmul.msk.bf16.gmra.mxu1 %vm72_vm1, %v291_v7 }
  0x17   :  { %285 = vmatmul.msk.bf16.gmra.mxu2 %vm72_vm1, %v293_v8  ;;  %287 = vmatmul.msk.bf16.gmra.mxu3 %vm72_vm1, %v295_v9 }
  0x83   :  { %v110_v10 = vpop.f32.mrf.mxu0  ;;  %v120_v11 = vpop.f32.mrf.mxu1 }
  0x84   :  { %150 = vst [vmem:[%s435_s2] sm:$0xff] %v110_v10  ;;  %v197_v22 = vmul.f32 %v110_v10, %v110_v10  ;;  %v201_v34 = vmul.f32 %v120_v11, %v120_v11 }
  0x85   :  { %154 = vst [vmem:[%s435_s2 + $0x20] sm:$0xff] %v120_v11 }
  0x8a   :  { %v130_v12 = vpop.f32.mrf.mxu2  ;;  %v367_v13 = vpop.f32.mrf.mxu3 }
  0x8b   :  { %v112_v14 = vpop.f32.mrf.mxu0  ;;  %v122_v15 = vpop.f32.mrf.mxu1  ;;  %158 = vst [vmem:[%s435_s2 + $0x40] sm:$0xff] %v130_v12  ;;  %v205_v48 = vmul.f32 %v130_v12, %v130_v12  ;;  %v209_v60 = vmul.f32 %v367_v13, %v367_v13 }
  0x8c   :  { %151 = vst [vmem:[%s435_s2 + $0x8] sm:$0xff] %v112_v14  ;;  %v198_v20 = vmul.f32 %v112_v14, %v112_v14  ;;  %v173_v23 = vadd.f32 %v112_v14, %v110_v10  ;;  %v202_v37 = vmul.f32 %v122_v15, %v122_v15 }
  0x8d   :  { %155 = vst [vmem:[%s435_s2 + $0x28] sm:$0xff] %v122_v15 }
  0x8e   :  { %162 = vst [vmem:[%s435_s2 + $0x60] sm:$0xff] %v367_v13  ;;  %v213_v25 = vadd.f32 %v198_v20, %v197_v22 }
  0x92   :  { %v132_v16 = vpop.f32.mrf.mxu2  ;;  %v142_v17 = vpop.f32.mrf.mxu3 }
  0x93   :  { %v115_v18 = vpop.f32.mrf.mxu0  ;;  %v125_v19 = vpop.f32.mrf.mxu1  ;;  %159 = vst [vmem:[%s435_s2 + $0x48] sm:$0xff] %v132_v16  ;;  %v206_v51 = vmul.f32 %v132_v16, %v132_v16  ;;  %v210_v63 = vmul.f32 %v142_v17, %v142_v17 }
  0x94   :  { %152 = vst [vmem:[%s435_s2 + $0x10] sm:$0xff] %v115_v18  ;;  %v199_v24 = vmul.f32 %v115_v18, %v115_v18  ;;  %v174_v26 = vadd.f32 %v173_v23, %v115_v18  ;;  %v203_v40 = vmul.f32 %v125_v19, %v125_v19 }
  0x95   :  { %156 = vst [vmem:[%s435_s2 + $0x30] sm:$0xff] %v125_v19 }
  0x96   :  { %163 = vst [vmem:[%s435_s2 + $0x68] sm:$0xff] %v142_v17  ;;  %v214_v31 = vadd.f32 %v213_v25, %v199_v24 }
  0x9a   :  { %v135_v27 = vpop.f32.mrf.mxu2  ;;  %v145_v28 = vpop.f32.mrf.mxu3 }
  0x9b   :  { %v117_v29 = vpop.f32.mrf.mxu0  ;;  %v127_v30 = vpop.f32.mrf.mxu1  ;;  %160 = vst [vmem:[%s435_s2 + $0x50] sm:$0xff] %v135_v27  ;;  %v207_v55 = vmul.f32 %v135_v27, %v135_v27  ;;  %v211_v3 = vmul.f32 %v145_v28, %v145_v28 }
  0x9c   :  { %153 = vst [vmem:[%s435_s2 + $0x18] sm:$0xff] %v117_v29  ;;  %v175_v32 = vadd.f32 %v174_v26, %v117_v29  ;;  %v200_v33 = vmul.f32 %v117_v29, %v117_v29  ;;  %v204_v46 = vmul.f32 %v127_v30, %v127_v30 }
  0x9d   :  { %157 = vst [vmem:[%s435_s2 + $0x38] sm:$0xff] %v127_v30 }
  0x9e   :  { %v176_v35 = vadd.f32 %v175_v32, %v120_v11  ;;  %v215_v36 = vadd.f32 %v214_v31, %v200_v33  ;;  %164 = vst [vmem:[%s435_s2 + $0x70] sm:$0xff] %v145_v28 }
  0xa0   :  { %v216_v38 = vadd.f32 %v215_v36, %v201_v34  ;;  %v177_v39 = vadd.f32 %v176_v35, %v122_v15 }
  0xa2   :  { %v178_v41 = vadd.f32 %v177_v39, %v125_v19  ;;  %v217_v42 = vadd.f32 %v216_v38, %v202_v37  ;;  %v137_v43 = vpop.f32.mrf.mxu2  ;;  %v147_v44 = vpop.f32.mrf.mxu3 }
  0xa3   :  { %161 = vst [vmem:[%s435_s2 + $0x58] sm:$0xff] %v137_v43  ;;  %v208_v59 = vmul.f32 %v137_v43, %v137_v43  ;;  %v212_v7 = vmul.f32 %v147_v44, %v147_v44 }
  0xa4   :  { %v179_v45 = vadd.f32 %v178_v41, %v127_v30  ;;  %v218_v47 = vadd.f32 %v217_v42, %v203_v40  ;;  %165 = vst [vmem:[%s435_s2 + $0x78] sm:$0xff] %v147_v44 }
  0xa6   :  { %v180_v49 = vadd.f32 %v179_v45, %v130_v12  ;;  %v219_v50 = vadd.f32 %v218_v47, %v204_v46 }
  0xa8   :  { %v220_v52 = vadd.f32 %v219_v50, %v205_v48  ;;  %v181_v53 = vadd.f32 %v180_v49, %v132_v16 }
  0xaa   :  { %v182_v54 = vadd.f32 %v181_v53, %v135_v27  ;;  %v221_v56 = vadd.f32 %v220_v52, %v206_v51 }
  0xac   :  { %v222_v57 = vadd.f32 %v221_v56, %v207_v55  ;;  %v183_v58 = vadd.f32 %v182_v54, %v137_v43 }
  0xae   :  { %v184_v61 = vadd.f32 %v183_v58, %v367_v13  ;;  %v223_v62 = vadd.f32 %v222_v57, %v208_v59 }
  0xb0   :  { %v224_v0 = vadd.f32 %v223_v62, %v209_v60  ;;  %v185_v1 = vadd.f32 %v184_v61, %v142_v17  ;;  %v172_v17 = vld [vmem:[%s436_s3] sm:$0x1] }
  0xb2   :  { %v186_v2 = vadd.f32 %v185_v1, %v145_v28  ;;  %v225_v4 = vadd.f32 %v224_v0, %v210_v63 }
  0xb4   :  { %v226_v5 = vadd.f32 %v225_v4, %v211_v3  ;;  %v187_v6 = vadd.f32 %v186_v2, %v147_v44 }
  0xb6   :  { %v188_v8 = vrot.slane %v187_v6, 4  ;;  %v227_v9 = vadd.f32 %v226_v5, %v212_v7 }
  0xb8   :  { %v189_v10 = vadd.f32 %v188_v8, %v187_v6  ;;  %v228_v11 = vrot.slane %v227_v9, 4 }
  0xba   :  { %v190_v12 = vrot.slane %v189_v10, 2  ;;  %v229_v14 = vadd.f32 %v228_v11, %v227_v9 }
  0xbc   :  { %v191_v15 = vadd.f32 %v190_v12, %v189_v10  ;;  %v230_v16 = vrot.slane %v229_v14, 2 }
  0xbe   :  { %v192_v18 = vrot.slane %v191_v15, 1  ;;  %v231_v13 = vadd.f32 %v230_v16, %v229_v14 }
  0xc0   :  { %v193_v19 = vadd.f32 %v192_v18, %v191_v15  ;;  %v232_v20 = vrot.slane %v231_v13, 1 }
  0xc2   :  { %v194_v22 = vadd.f32 %v193_v19, %v172_v17  ;;  %v233_v23 = vadd.f32 %v232_v20, %v231_v13 }
  0xc4   :  { %195 = vst [vmem:[%s436_s3] sm:$0x1] %v194_v22  ;;  %v234_v24 = vadd.f32 %v233_v23, %v196_v21 }
  0xc6   :  { %235 = vst [vmem:[%s437_s4] sm:$0x1] %v234_v24 }

// kernel: resblock_forward.6
= control target key start
LH: loop header
LB: loop body
LE: loop exit
PB: predicated region body
PF: predicated region fallthrough
CT: control target
= control target key end

     0   :  { %s287_s0 = inlined_call_operand.vmem [shape: f32[128,128], index: 0, kind: input, shape index: {}]   ;;  %s288_s1 = inlined_call_operand.vmem [shape: f32[1,128], index: 1, kind: input, shape index: {}]   ;;  %s289_s2 = inlined_call_operand.vmem [shape: f32[1,128], index: 2, kind: input, shape index: {}]   ;;  %s290_s3 = inlined_call_operand.vmem [shape: bf16[128,128], index: 3, kind: output, shape index: {}]  }
   0x1   :  { %v14_v0 = vld [vmem:[%s287_s0] sm:$0xff]  ;;  %v15_v1 = vld [vmem:[%s287_s0 + $0x8] sm:$0xff]  ;;  %v16_v4 = vld [vmem:[%s287_s0 + $0x10] sm:$0xff] }
   0x2   :  { %v169_v2 = vld [vmem:[%s288_s1] ss:$0 sm:$0xff]  ;;  %v17_v5 = vld [vmem:[%s287_s0 + $0x18] sm:$0xff]  ;;  %v19_v11 = vld [vmem:[%s287_s0 + $0x28] sm:$0xff] }
   0x3   :  { %v203_v3 = vld [vmem:[%s289_s2] ss:$0 sm:$0xff]  ;;  %v34_v7 = vmul.f32 %v169_v2, %v14_v0  ;;  %v35_v8 = vmul.f32 %v169_v2, %v15_v1  ;;  %v36_v9 = vmul.f32 %v169_v2, %v16_v4  ;;  %v37_v10 = vmul.f32 %v169_v2, %v17_v5  ;;  %v20_v12 = vld [vmem:[%s287_s0 + $0x30] sm:$0xff]  ;;  %v21_v13 = vld [vmem:[%s287_s0 + $0x38] sm:$0xff] }
   0x4   :  { %v18_v6 = vld [vmem:[%s287_s0 + $0x20] sm:$0xff]  ;;  %v39_v15 = vmul.f32 %v169_v2, %v19_v11  ;;  %v40_v16 = vmul.f32 %v169_v2, %v20_v12  ;;  %v41_v17 = vmul.f32 %v169_v2, %v21_v13  ;;  %v23_v27 = vld [vmem:[%s287_s0 + $0x48] sm:$0xff]  ;;  %v24_v32 = vld [vmem:[%s287_s0 + $0x50] sm:$0xff] }
   0x5   :  { %v38_v14 = vmul.f32 %v169_v2, %v18_v6  ;;  %v54_v18 = vadd.f32 %v203_v3, %v34_v7  ;;  %v55_v19 = vadd.f32 %v203_v3, %v35_v8  ;;  %v56_v20 = vadd.f32 %v203_v3, %v36_v9  ;;  %v22_v26 = vld [vmem:[%s287_s0 + $0x40] sm:$0xff]  ;;  %v25_v33 = vld [vmem:[%s287_s0 + $0x58] sm:$0xff]  ;;  %v27_v39 = vld [vmem:[%s287_s0 + $0x68] sm:$0xff] }
   0x6   :  { %v57_v21 = vadd.f32 %v203_v3, %v37_v10  ;;  %v59_v23 = vadd.f32 %v203_v3, %v39_v15  ;;  %v60_v24 = vadd.f32 %v203_v3, %v40_v16  ;;  %v61_v25 = vadd.f32 %v203_v3, %v41_v17  ;;  %v26_v38 = vld [vmem:[%s287_s0 + $0x60] sm:$0xff]  ;;  %v28_v44 = vld [vmem:[%s287_s0 + $0x70] sm:$0xff]  ;;  %v29_v45 = vld [vmem:[%s287_s0 + $0x78] sm:$0xff] }
   0x7   :  { %v58_v22 = vadd.f32 %v203_v3, %v38_v14  ;;  %v70_v28 = vmax.f32 %v54_v18, 0.0  ;;  %v71_v29 = vmax.f32 %v55_v19, 0.0  ;;  %v72_v30 = vmax.f32 %v56_v20, 0.0 }
   0x8   :  { %v73_v31 = vmax.f32 %v57_v21, 0.0  ;;  %v75_v35 = vmax.f32 %v59_v23, 0.0  ;;  %v76_v36 = vmax.f32 %v60_v24, 0.0  ;;  %v77_v37 = vmax.f32 %v61_v25, 0.0 }
   0x9   :  { %v74_v34 = vmax.f32 %v58_v22, 0.0  ;;  %v125_v40 = vpack.c.bf16 %v71_v29, %v70_v28  ;;  %v42_v42 = vmul.f32 %v169_v2, %v22_v26  ;;  %v43_v43 = vmul.f32 %v169_v2, %v23_v27 }
   0xa   :  { %v130_v41 = vpack.c.bf16 %v73_v31, %v72_v30  ;;  %v140_v47 = vpack.c.bf16 %v77_v37, %v76_v36  ;;  %v44_v48 = vmul.f32 %v169_v2, %v24_v32  ;;  %v45_v49 = vmul.f32 %v169_v2, %v25_v33 }
   0xb   :  { %v135_v46 = vpack.c.bf16 %v75_v35, %v74_v34  ;;  %126 = vst [vmem:[%s290_s3] sm:$0xff] %v125_v40   ;;  %v62_v50 = vadd.f32 %v203_v3, %v42_v42  ;;  %v63_v51 = vadd.f32 %v203_v3, %v43_v43  ;;  %v46_v52 = vmul.f32 %v169_v2, %v26_v38 }
   0xc   :  { %v47_v53 = vmul.f32 %v169_v2, %v27_v39  ;;  %162 = vst [vmem:[%s290_s3 + $0x8] sm:$0xff] %v130_v41   ;;  %v64_v54 = vadd.f32 %v203_v3, %v44_v48  ;;  %v65_v55 = vadd.f32 %v203_v3, %v45_v49  ;;  %v48_v56 = vmul.f32 %v169_v2, %v28_v44 }
   0xd   :  { %v49_v57 = vmul.f32 %v169_v2, %v29_v45  ;;  %163 = vst [vmem:[%s290_s3 + $0x10] sm:$0xff] %v135_v46   ;;  %v78_v58 = vmax.f32 %v62_v50, 0.0  ;;  %v79_v59 = vmax.f32 %v63_v51, 0.0  ;;  %v66_v60 = vadd.f32 %v203_v3, %v46_v52 }
   0xe   :  { %v67_v61 = vadd.f32 %v203_v3, %v47_v53  ;;  %164 = vst [vmem:[%s290_s3 + $0x18] sm:$0xff] %v140_v47   ;;  %v80_v62 = vmax.f32 %v64_v54, 0.0  ;;  %v81_v63 = vmax.f32 %v65_v55, 0.0  ;;  %v68_v0 = vadd.f32 %v203_v3, %v48_v56 }
   0xf   :  { %v69_v1 = vadd.f32 %v203_v3, %v49_v57  ;;  %v145_v2 = vpack.c.bf16 %v79_v59, %v78_v58  ;;  %v82_v4 = vmax.f32 %v66_v60, 0.0 }
  0x10   :  { %v83_v5 = vmax.f32 %v67_v61, 0.0  ;;  %v150_v6 = vpack.c.bf16 %v81_v63, %v80_v62  ;;  %v84_v7 = vmax.f32 %v68_v0, 0.0 }
  0x11   :  { %v85_v8 = vmax.f32 %v69_v1, 0.0  ;;  %165 = vst [vmem:[%s290_s3 + $0x20] sm:$0xff] %v145_v2  }
  0x12   :  { %v155_v9 = vpack.c.bf16 %v83_v5, %v82_v4  ;;  %166 = vst [vmem:[%s290_s3 + $0x28] sm:$0xff] %v150_v6  }
  0x13   :  { %v160_v10 = vpack.c.bf16 %v85_v8, %v84_v7 }
  0x14   :  { %167 = vst [vmem:[%s290_s3 + $0x30] sm:$0xff] %v155_v9  }
  0x15   :  { %168 = vst [vmem:[%s290_s3 + $0x38] sm:$0xff] %v160_v10  }

// kernel: resblock_forward.5
= control target key start
LH: loop header
LB: loop body
LE: loop exit
PB: predicated region body
PF: predicated region fallthrough
CT: control target
= control target key end

     0   :  { %vm116_vm0 = vcmask 1041408   ;;  %vm91_vm1 = vcmask 293888   ;;  %v335_v25 = vmov 0.0   ;;  %s474_s1 = inlined_call_operand.vmem [shape: bf16[36,128], index: 1, kind: input, shape index: {}]   ;;  %s475_s0 = inlined_call_operand.vmem [shape: bf16[128,36], index: 0, kind: input, shape index: {}]   ;;  %s476_s2 = inlined_call_operand.vmem [shape: f32[128,128], index: 2, kind: output, shape index: {0}]   ;;  %s477_s3 = inlined_call_operand.vmem [shape: f32[1,128], index: 3, kind: output, shape index: {1}]   ;;  %s478_s4 = inlined_call_operand.vmem [shape: f32[1,128], index: 4, kind: output, shape index: {2}]  }
   0x1   :  { %v35_v0 = vld [vmem:[%s474_s1 + $0x10] sm:$0x3]  ;;  %v324_v4 = vld [vmem:[%s474_s1 + $0x8] sm:$0xff]  ;;  %v323_v5 = vld [vmem:[%s474_s1] sm:$0xff]  ;;  %189 = vst [vmem:[%s477_s3] sm:$0x1] %v335_v25 }
   0x2   :  { %v85_v1 = vunpack.c.l.b16 %v35_v0  ;;  %v315_v6 = vld [vmem:[%s475_s0] sm:$0xff]  ;;  %v317_v7 = vld [vmem:[%s475_s0 + $0x10] sm:$0xff]  ;;  %v316_v10 = vld [vmem:[%s475_s0 + $0x8] sm:$0xff]  ;;  %190 = vst [vmem:[%s478_s4] sm:$0x1] %v335_v25 }
   0x3   :  { %v319_v8 = vld [vmem:[%s475_s0 + $0x20] sm:$0xff]  ;;  %v321_v9 = vld [vmem:[%s475_s0 + $0x30] sm:$0xff]  ;;  %v318_v11 = vld [vmem:[%s475_s0 + $0x18] sm:$0xff] }
   0x4   :  { %v88_v2 = vpack.c.b16 %v85_v1, %v85_v1  ;;  %v320_v12 = vld [vmem:[%s475_s0 + $0x28] sm:$0xff]  ;;  %v322_v13 = vld [vmem:[%s475_s0 + $0x38] sm:$0xff] }
   0x6   :  { %v118_v3 = vsel %vm116_vm0, %v88_v2, 0 }
   0x7   :  { %125 = vmatpush.bf16.msra.mxu0 %v118_v3  ;;  %325 = vmatpush.bf16.msra.mxu1 %v118_v3 }
   0x8   :  { %326 = vmatpush.bf16.msra.mxu2 %v118_v3  ;;  %327 = vmatpush.bf16.msra.mxu3 %v118_v3 }
   0x9   :  { %v215_v25 = vld [vmem:[%s478_s4] sm:$0x1] }
   0xb   :  { %126 = vmatpush.bf16.msra.mxu0 %v324_v4  ;;  %328 = vmatpush.bf16.msra.mxu1 %v324_v4 }
   0xc   :  { %329 = vmatpush.bf16.msra.mxu2 %v324_v4  ;;  %330 = vmatpush.bf16.msra.mxu3 %v324_v4 }
   0xf   :  { %127 = vmatpush.bf16.msra.mxu0 %v323_v5  ;;  %331 = vmatpush.bf16.msra.mxu1 %v323_v5 }
  0x10   :  { %332 = vmatpush.bf16.msra.mxu2 %v323_v5  ;;  %333 = vmatpush.bf16.msra.mxu3 %v323_v5 }
  0x12   :  { %307 = vmatmul.msk.bf16.vlgmr.msra.gmra.mxu0 %vm91_vm1, %v315_v6  ;;  %309 = vmatmul.msk.bf16.vlgmr.msra.gmra.mxu1 %vm91_vm1, %v317_v7 }
  0x13   :  { %311 = vmatmul.msk.bf16.vlgmr.msra.gmra.mxu2 %vm91_vm1, %v319_v8  ;;  %313 = vmatmul.msk.bf16.vlgmr.msra.gmra.mxu3 %vm91_vm1, %v321_v9 }
  0x22   :  { %308 = vmatmul.msk.bf16.gmra.mxu0 %vm91_vm1, %v316_v10  ;;  %310 = vmatmul.msk.bf16.gmra.mxu1 %vm91_vm1, %v318_v11 }
  0x23   :  { %312 = vmatmul.msk.bf16.gmra.mxu2 %vm91_vm1, %v320_v12  ;;  %314 = vmatmul.msk.bf16.gmra.mxu3 %vm91_vm1, %v322_v13 }
  0x8f   :  { %v129_v14 = vpop.f32.mrf.mxu0  ;;  %v139_v15 = vpop.f32.mrf.mxu1 }
  0x90   :  { %169 = vst [vmem:[%s476_s2] sm:$0xff] %v129_v14  ;;  %v216_v26 = vmul.f32 %v129_v14, %v129_v14  ;;  %v220_v38 = vmul.f32 %v139_v15, %v139_v15 }
  0x91   :  { %173 = vst [vmem:[%s476_s2 + $0x20] sm:$0xff] %v139_v15 }
  0x96   :  { %v149_v16 = vpop.f32.mrf.mxu2  ;;  %v408_v17 = vpop.f32.mrf.mxu3 }
  0x97   :  { %v131_v18 = vpop.f32.mrf.mxu0  ;;  %v141_v19 = vpop.f32.mrf.mxu1  ;;  %177 = vst [vmem:[%s476_s2 + $0x40] sm:$0xff] %v149_v16  ;;  %v224_v52 = vmul.f32 %v149_v16, %v149_v16  ;;  %v228_v0 = vmul.f32 %v408_v17, %v408_v17 }
  0x98   :  { %170 = vst [vmem:[%s476_s2 + $0x8] sm:$0xff] %v131_v18  ;;  %v217_v24 = vmul.f32 %v131_v18, %v131_v18  ;;  %v192_v27 = vadd.f32 %v131_v18, %v129_v14  ;;  %v221_v41 = vmul.f32 %v141_v19, %v141_v19 }
  0x99   :  { %174 = vst [vmem:[%s476_s2 + $0x28] sm:$0xff] %v141_v19 }
  0x9a   :  { %181 = vst [vmem:[%s476_s2 + $0x60] sm:$0xff] %v408_v17  ;;  %v232_v29 = vadd.f32 %v217_v24, %v216_v26 }
  0x9e   :  { %v151_v20 = vpop.f32.mrf.mxu2  ;;  %v161_v21 = vpop.f32.mrf.mxu3 }
  0x9f   :  { %v134_v22 = vpop.f32.mrf.mxu0  ;;  %v144_v23 = vpop.f32.mrf.mxu1  ;;  %178 = vst [vmem:[%s476_s2 + $0x48] sm:$0xff] %v151_v20  ;;  %v225_v55 = vmul.f32 %v151_v20, %v151_v20  ;;  %v229_v3 = vmul.f32 %v161_v21, %v161_v21 }
  0xa0   :  { %171 = vst [vmem:[%s476_s2 + $0x10] sm:$0xff] %v134_v22  ;;  %v218_v28 = vmul.f32 %v134_v22, %v134_v22  ;;  %v193_v30 = vadd.f32 %v192_v27, %v134_v22  ;;  %v222_v44 = vmul.f32 %v144_v23, %v144_v23 }
  0xa1   :  { %175 = vst [vmem:[%s476_s2 + $0x30] sm:$0xff] %v144_v23 }
  0xa2   :  { %182 = vst [vmem:[%s476_s2 + $0x68] sm:$0xff] %v161_v21  ;;  %v233_v35 = vadd.f32 %v232_v29, %v218_v28 }
  0xa6   :  { %v154_v31 = vpop.f32.mrf.mxu2  ;;  %v164_v32 = vpop.f32.mrf.mxu3 }
  0xa7   :  { %v136_v33 = vpop.f32.mrf.mxu0  ;;  %v146_v34 = vpop.f32.mrf.mxu1  ;;  %179 = vst [vmem:[%s476_s2 + $0x50] sm:$0xff] %v154_v31  ;;  %v226_v59 = vmul.f32 %v154_v31, %v154_v31  ;;  %v230_v7 = vmul.f32 %v164_v32, %v164_v32 }
  0xa8   :  { %172 = vst [vmem:[%s476_s2 + $0x18] sm:$0xff] %v136_v33  ;;  %v194_v36 = vadd.f32 %v193_v30, %v136_v33  ;;  %v219_v37 = vmul.f32 %v136_v33, %v136_v33  ;;  %v223_v50 = vmul.f32 %v146_v34, %v146_v34 }
  0xa9   :  { %176 = vst [vmem:[%s476_s2 + $0x38] sm:$0xff] %v146_v34 }
  0xaa   :  { %v195_v39 = vadd.f32 %v194_v36, %v139_v15  ;;  %v234_v40 = vadd.f32 %v233_v35, %v219_v37  ;;  %183 = vst [vmem:[%s476_s2 + $0x70] sm:$0xff] %v164_v32 }
  0xac   :  { %v235_v42 = vadd.f32 %v234_v40, %v220_v38  ;;  %v196_v43 = vadd.f32 %v195_v39, %v141_v19 }
  0xae   :  { %v197_v45 = vadd.f32 %v196_v43, %v144_v23  ;;  %v236_v46 = vadd.f32 %v235_v42, %v221_v41  ;;  %v156_v47 = vpop.f32.mrf.mxu2  ;;  %v166_v48 = vpop.f32.mrf.mxu3 }
  0xaf   :  { %180 = vst [vmem:[%s476_s2 + $0x58] sm:$0xff] %v156_v47  ;;  %v227_v63 = vmul.f32 %v156_v47, %v156_v47  ;;  %v231_v11 = vmul.f32 %v166_v48, %v166_v48 }
  0xb0   :  { %v198_v49 = vadd.f32 %v197_v45, %v146_v34  ;;  %v237_v51 = vadd.f32 %v236_v46, %v222_v44  ;;  %184 = vst [vmem:[%s476_s2 + $0x78] sm:$0xff] %v166_v48 }
  0xb2   :  { %v199_v53 = vadd.f32 %v198_v49, %v149_v16  ;;  %v238_v54 = vadd.f32 %v237_v51, %v223_v50 }
  0xb4   :  { %v239_v56 = vadd.f32 %v238_v54, %v224_v52  ;;  %v200_v57 = vadd.f32 %v199_v53, %v151_v20 }
  0xb6   :  { %v201_v58 = vadd.f32 %v200_v57, %v154_v31  ;;  %v240_v60 = vadd.f32 %v239_v56, %v225_v55 }
  0xb8   :  { %v241_v61 = vadd.f32 %v240_v60, %v226_v59  ;;  %v202_v62 = vadd.f32 %v201_v58, %v156_v47 }
  0xba   :  { %v203_v1 = vadd.f32 %v202_v62, %v408_v17  ;;  %v242_v2 = vadd.f32 %v241_v61, %v227_v63 }
  0xbc   :  { %v243_v4 = vadd.f32 %v242_v2, %v228_v0  ;;  %v204_v5 = vadd.f32 %v203_v1, %v161_v21  ;;  %v191_v21 = vld [vmem:[%s477_s3] sm:$0x1] }
  0xbe   :  { %v205_v6 = vadd.f32 %v204_v5, %v164_v32  ;;  %v244_v8 = vadd.f32 %v243_v4, %v229_v3 }
  0xc0   :  { %v245_v9 = vadd.f32 %v244_v8, %v230_v7  ;;  %v206_v10 = vadd.f32 %v205_v6, %v166_v48 }
  0xc2   :  { %v207_v12 = vrot.slane %v206_v10, 4  ;;  %v246_v13 = vadd.f32 %v245_v9, %v231_v11 }
  0xc4   :  { %v208_v14 = vadd.f32 %v207_v12, %v206_v10  ;;  %v247_v15 = vrot.slane %v246_v13, 4 }
  0xc6   :  { %v209_v16 = vrot.slane %v208_v14, 2  ;;  %v248_v18 = vadd.f32 %v247_v15, %v246_v13 }
  0xc8   :  { %v210_v19 = vadd.f32 %v209_v16, %v208_v14  ;;  %v249_v20 = vrot.slane %v248_v18, 2 }
  0xca   :  { %v211_v22 = vrot.slane %v210_v19, 1  ;;  %v250_v17 = vadd.f32 %v249_v20, %v248_v18 }
  0xcc   :  { %v212_v23 = vadd.f32 %v211_v22, %v210_v19  ;;  %v251_v24 = vrot.slane %v250_v17, 1 }
  0xce   :  { %v213_v26 = vadd.f32 %v212_v23, %v191_v21  ;;  %v252_v27 = vadd.f32 %v251_v24, %v250_v17 }
  0xd0   :  { %214 = vst [vmem:[%s477_s3] sm:$0x1] %v213_v26  ;;  %v253_v28 = vadd.f32 %v252_v27, %v215_v25 }
  0xd2   :  { %254 = vst [vmem:[%s478_s4] sm:$0x1] %v253_v28 }

// kernel: resblock_forward.9
= control target key start
LH: loop header
LB: loop body
LE: loop exit
PB: predicated region body
PF: predicated region fallthrough
CT: control target
= control target key end

     0   :  { %s454_s0 = inlined_call_operand.vmem [shape: f32[128,128], index: 0, kind: input, shape index: {}]   ;;  %s455_s1 = inlined_call_operand.vmem [shape: f32[1,128], index: 1, kind: input, shape index: {}]   ;;  %s456_s2 = inlined_call_operand.vmem [shape: f32[1,128], index: 2, kind: input, shape index: {}]   ;;  %s457_s3 = inlined_call_operand.vmem [shape: f32[128,128], index: 3, kind: input, shape index: {}]   ;;  %s458_s4 = inlined_call_operand.vmem [shape: f32[1,128], index: 4, kind: input, shape index: {}]   ;;  %s459_s5 = inlined_call_operand.vmem [shape: f32[1,128], index: 5, kind: input, shape index: {}]   ;;  %s460_s6 = inlined_call_operand.vmem [shape: f32[128,128], index: 6, kind: output, shape index: {}]  }
   0x1   :  { %v23_v0 = vld [vmem:[%s454_s0] sm:$0xff]  ;;  %v24_v7 = vld [vmem:[%s454_s0 + $0x8] sm:$0xff]  ;;  %v25_v13 = vld [vmem:[%s454_s0 + $0x10] sm:$0xff] }
   0x2   :  { %v232_v1 = vld [vmem:[%s455_s1] ss:$0 sm:$0xff]  ;;  %v80_v8 = vld [vmem:[%s457_s3 + $0x8] sm:$0xff]  ;;  %v81_v14 = vld [vmem:[%s457_s3 + $0x10] sm:$0xff] }
   0x3   :  { %v237_v2 = vld [vmem:[%s456_s2] ss:$0 sm:$0xff]  ;;  %v43_v4 = vmul.f32 %v232_v1, %v23_v0  ;;  %v44_v11 = vmul.f32 %v232_v1, %v24_v7  ;;  %v26_v15 = vld [vmem:[%s454_s0 + $0x18] sm:$0xff]  ;;  %v45_v16 = vmul.f32 %v232_v1, %v25_v13  ;;  %v28_v26 = vld [vmem:[%s454_s0 + $0x28] sm:$0xff] }
   0x4   :  { %v79_v3 = vld [vmem:[%s457_s3] sm:$0xff]  ;;  %v46_v18 = vmul.f32 %v232_v1, %v26_v15  ;;  %v82_v19 = vld [vmem:[%s457_s3 + $0x18] sm:$0xff]  ;;  %v84_v27 = vld [vmem:[%s457_s3 + $0x28] sm:$0xff]  ;;  %v48_v39 = vmul.f32 %v232_v1, %v28_v26 }
   0x5   :  { %v246_v5 = vld [vmem:[%s458_s4] ss:$0 sm:$0xff]  ;;  %v63_v9 = vadd.f32 %v237_v2, %v43_v4  ;;  %v64_v23 = vadd.f32 %v237_v2, %v44_v11  ;;  %v65_v28 = vadd.f32 %v237_v2, %v45_v16  ;;  %v29_v36 = vld [vmem:[%s454_s0 + $0x30] sm:$0xff]  ;;  %v30_v42 = vld [vmem:[%s454_s0 + $0x38] sm:$0xff] }
   0x6   :  { %v251_v6 = vld [vmem:[%s459_s5] ss:$0 sm:$0xff]  ;;  %v99_v10 = vmul.f32 %v246_v5, %v79_v3  ;;  %v100_v12 = vmul.f32 %v246_v5, %v80_v8  ;;  %v101_v17 = vmul.f32 %v246_v5, %v81_v14  ;;  %v102_v25 = vmul.f32 %v246_v5, %v82_v19  ;;  %v85_v41 = vld [vmem:[%s457_s3 + $0x30] sm:$0xff]  ;;  %v86_v47 = vld [vmem:[%s457_s3 + $0x38] sm:$0xff] }
   0x7   :  { %v27_v20 = vld [vmem:[%s454_s0 + $0x20] sm:$0xff]  ;;  %v66_v30 = vadd.f32 %v237_v2, %v46_v18  ;;  %v104_v40 = vmul.f32 %v246_v5, %v84_v27  ;;  %v68_v50 = vadd.f32 %v237_v2, %v48_v39  ;;  %v49_v52 = vmul.f32 %v232_v1, %v29_v36  ;;  %v32_v58 = vld [vmem:[%s454_s0 + $0x48] sm:$0xff]  ;;  %v33_v0 = vld [vmem:[%s454_s0 + $0x50] sm:$0xff] }
   0x8   :  { %v83_v21 = vld [vmem:[%s457_s3 + $0x20] sm:$0xff]  ;;  %v119_v22 = vadd.f32 %v251_v6, %v99_v10  ;;  %v120_v24 = vadd.f32 %v251_v6, %v100_v12  ;;  %v121_v29 = vadd.f32 %v251_v6, %v101_v17  ;;  %v47_v31 = vmul.f32 %v232_v1, %v27_v20  ;;  %v88_v63 = vld [vmem:[%s457_s3 + $0x48] sm:$0xff]  ;;  %v34_v10 = vld [vmem:[%s454_s0 + $0x58] sm:$0xff] }
   0x9   :  { %v122_v34 = vadd.f32 %v251_v6, %v102_v25  ;;  %v103_v35 = vmul.f32 %v246_v5, %v83_v21  ;;  %v31_v48 = vld [vmem:[%s454_s0 + $0x40] sm:$0xff]  ;;  %v124_v51 = vadd.f32 %v251_v6, %v104_v40  ;;  %v105_v56 = vmul.f32 %v246_v5, %v85_v41  ;;  %v90_v19 = vld [vmem:[%s457_s3 + $0x58] sm:$0xff]  ;;  %v37_v36 = vld [vmem:[%s454_s0 + $0x70] sm:$0xff] }
   0xa   :  { %v135_v32 = vadd.f32 %v119_v22, %v63_v9  ;;  %v136_v33 = vadd.f32 %v120_v24, %v64_v23  ;;  %v137_v37 = vadd.f32 %v121_v29, %v65_v28  ;;  %v67_v38 = vadd.f32 %v237_v2, %v47_v31  ;;  %v87_v53 = vld [vmem:[%s457_s3 + $0x40] sm:$0xff]  ;;  %v89_v9 = vld [vmem:[%s457_s3 + $0x50] sm:$0xff]  ;;  %v92_v31 = vld [vmem:[%s457_s3 + $0x68] sm:$0xff] }
   0xb   :  { %v138_v45 = vadd.f32 %v122_v34, %v66_v30  ;;  %v123_v46 = vadd.f32 %v251_v6, %v103_v35  ;;  %v50_v57 = vmul.f32 %v232_v1, %v30_v42  ;;  %v140_v59 = vadd.f32 %v124_v51, %v68_v50  ;;  %v35_v24 = vld [vmem:[%s454_s0 + $0x60] sm:$0xff]  ;;  %v36_v30 = vld [vmem:[%s454_s0 + $0x68] sm:$0xff]  ;;  %v94_v51 = vld [vmem:[%s457_s3 + $0x78] sm:$0xff] }
   0xc   :  { %v151_v43 = vmax.f32 %v135_v32, 0.0  ;;  %v152_v44 = vmax.f32 %v136_v33, 0.0  ;;  %v153_v49 = vmax.f32 %v137_v37, 0.0  ;;  %v69_v60 = vadd.f32 %v237_v2, %v49_v52  ;;  %v91_v25 = vld [vmem:[%s457_s3 + $0x60] sm:$0xff] }
   0xd   :  { %v154_v54 = vmax.f32 %v138_v45, 0.0  ;;  %v139_v55 = vadd.f32 %v123_v46, %v67_v38  ;;  %v106_v61 = vmul.f32 %v246_v5, %v86_v47  ;;  %v51_v62 = vmul.f32 %v232_v1, %v31_v48  ;;  %v93_v45 = vld [vmem:[%s457_s3 + $0x70] sm:$0xff]  ;;  %v38_v46 = vld [vmem:[%s454_s0 + $0x78] sm:$0xff] }
   0xe   :  { %167 = vst [vmem:[%s460_s6] sm:$0xff] %v151_v43  ;;  %v125_v4 = vadd.f32 %v251_v6, %v105_v56  ;;  %v70_v7 = vadd.f32 %v237_v2, %v50_v57  ;;  %v107_v8 = vmul.f32 %v246_v5, %v87_v53  ;;  %v156_v11 = vmax.f32 %v140_v59, 0.0 }
   0xf   :  { %168 = vst [vmem:[%s460_s6 + $0x8] sm:$0xff] %v152_v44  ;;  %v155_v3 = vmax.f32 %v139_v55, 0.0  ;;  %v126_v12 = vadd.f32 %v251_v6, %v106_v61  ;;  %v71_v13 = vadd.f32 %v237_v2, %v51_v62  ;;  %v52_v14 = vmul.f32 %v232_v1, %v32_v58 }
  0x10   :  { %169 = vst [vmem:[%s460_s6 + $0x10] sm:$0xff] %v153_v49  ;;  %v141_v15 = vadd.f32 %v125_v4, %v69_v60  ;;  %v127_v16 = vadd.f32 %v251_v6, %v107_v8  ;;  %v108_v17 = vmul.f32 %v246_v5, %v88_v63  ;;  %v53_v18 = vmul.f32 %v232_v1, %v33_v0 }
  0x11   :  { %170 = vst [vmem:[%s460_s6 + $0x18] sm:$0xff] %v154_v54  ;;  %v142_v20 = vadd.f32 %v126_v12, %v70_v7  ;;  %v72_v21 = vadd.f32 %v237_v2, %v52_v14  ;;  %v109_v22 = vmul.f32 %v246_v5, %v89_v9  ;;  %v54_v23 = vmul.f32 %v232_v1, %v34_v10 }
  0x12   :  { %171 = vst [vmem:[%s460_s6 + $0x20] sm:$0xff] %v155_v3  ;;  %v157_v26 = vmax.f32 %v141_v15, 0.0  ;;  %v143_v27 = vadd.f32 %v127_v16, %v71_v13  ;;  %v128_v28 = vadd.f32 %v251_v6, %v108_v17  ;;  %v73_v29 = vadd.f32 %v237_v2, %v53_v18 }
  0x13   :  { %172 = vst [vmem:[%s460_s6 + $0x28] sm:$0xff] %v156_v11  ;;  %v158_v32 = vmax.f32 %v142_v20, 0.0  ;;  %v129_v33 = vadd.f32 %v251_v6, %v109_v22  ;;  %v74_v34 = vadd.f32 %v237_v2, %v54_v23  ;;  %v110_v35 = vmul.f32 %v246_v5, %v90_v19 }
  0x14   :  { %173 = vst [vmem:[%s460_s6 + $0x30] sm:$0xff] %v157_v26  ;;  %v159_v37 = vmax.f32 %v143_v27, 0.0  ;;  %v144_v38 = vadd.f32 %v128_v28, %v72_v21  ;;  %v55_v39 = vmul.f32 %v232_v1, %v35_v24  ;;  %v111_v40 = vmul.f32 %v246_v5, %v91_v25 }
  0x15   :  { %174 = vst [vmem:[%s460_s6 + $0x38] sm:$0xff] %v158_v32  ;;  %v145_v41 = vadd.f32 %v129_v33, %v73_v29  ;;  %v130_v42 = vadd.f32 %v251_v6, %v110_v35  ;;  %v56_v43 = vmul.f32 %v232_v1, %v36_v30  ;;  %v112_v44 = vmul.f32 %v246_v5, %v92_v31 }
  0x16   :  { %175 = vst [vmem:[%s460_s6 + $0x40] sm:$0xff] %v159_v37  ;;  %v160_v47 = vmax.f32 %v144_v38, 0.0  ;;  %v75_v48 = vadd.f32 %v237_v2, %v55_v39  ;;  %v131_v49 = vadd.f32 %v251_v6, %v111_v40  ;;  %v57_v50 = vmul.f32 %v232_v1, %v37_v36 }
  0x17   :  { %v161_v52 = vmax.f32 %v145_v41, 0.0  ;;  %v146_v53 = vadd.f32 %v130_v42, %v74_v34  ;;  %v76_v54 = vadd.f32 %v237_v2, %v56_v43  ;;  %v132_v55 = vadd.f32 %v251_v6, %v112_v44 }
  0x18   :  { %176 = vst [vmem:[%s460_s6 + $0x48] sm:$0xff] %v160_v47  ;;  %v147_v56 = vadd.f32 %v131_v49, %v75_v48  ;;  %v77_v57 = vadd.f32 %v237_v2, %v57_v50  ;;  %v113_v58 = vmul.f32 %v246_v5, %v93_v45  ;;  %v58_v59 = vmul.f32 %v232_v1, %v38_v46 }
  0x19   :  { %177 = vst [vmem:[%s460_s6 + $0x50] sm:$0xff] %v161_v52  ;;  %v162_v60 = vmax.f32 %v146_v53, 0.0  ;;  %v148_v61 = vadd.f32 %v132_v55, %v76_v54  ;;  %v114_v62 = vmul.f32 %v246_v5, %v94_v51 }
  0x1a   :  { %v163_v63 = vmax.f32 %v147_v56, 0.0  ;;  %v133_v0 = vadd.f32 %v251_v6, %v113_v58  ;;  %v78_v3 = vadd.f32 %v237_v2, %v58_v59 }
  0x1b   :  { %178 = vst [vmem:[%s460_s6 + $0x58] sm:$0xff] %v162_v60  ;;  %v164_v4 = vmax.f32 %v148_v61, 0.0  ;;  %v134_v1 = vadd.f32 %v251_v6, %v114_v62 }
  0x1c   :  { %179 = vst [vmem:[%s460_s6 + $0x60] sm:$0xff] %v163_v63  ;;  %v149_v7 = vadd.f32 %v133_v0, %v77_v57 }
  0x1d   :  { %180 = vst [vmem:[%s460_s6 + $0x68] sm:$0xff] %v164_v4  ;;  %v150_v5 = vadd.f32 %v134_v1, %v78_v3 }
  0x1e   :  { %v165_v8 = vmax.f32 %v149_v7, 0.0 }
  0x1f   :  { %v166_v9 = vmax.f32 %v150_v5, 0.0 }
  0x20   :  { %181 = vst [vmem:[%s460_s6 + $0x70] sm:$0xff] %v165_v8 }
  0x21   :  { %182 = vst [vmem:[%s460_s6 + $0x78] sm:$0xff] %v166_v9 }

// kernel: resblock_forward.8
= control target key start
LH: loop header
LB: loop body
LE: loop exit
PB: predicated region body
PF: predicated region fallthrough
CT: control target
= control target key end

     0   :  { %vm132_vm0 = vcmask 1043456   ;;  %vm107_vm1 = vcmask 588800   ;;  %v367_v27 = vmov 0.0   ;;  %s512_s1 = inlined_call_operand.vmem [shape: bf16[72,128], index: 1, kind: input, shape index: {}]   ;;  %s513_s0 = inlined_call_operand.vmem [shape: bf16[128,72], index: 0, kind: input, shape index: {}]   ;;  %s514_s2 = inlined_call_operand.vmem [shape: f32[128,128], index: 2, kind: output, shape index: {0}]   ;;  %s515_s3 = inlined_call_operand.vmem [shape: f32[1,128], index: 3, kind: output, shape index: {1}]   ;;  %s516_s4 = inlined_call_operand.vmem [shape: f32[1,128], index: 4, kind: output, shape index: {2}]  }
   0x1   :  { %v39_v0 = vld [vmem:[%s512_s1 + $0x20] sm:$0xf]  ;;  %v350_v4 = vld [vmem:[%s512_s1 + $0x18] sm:$0xff]  ;;  %v349_v5 = vld [vmem:[%s512_s1 + $0x10] sm:$0xff]  ;;  %205 = vst [vmem:[%s515_s3] sm:$0x1] %v367_v27 }
   0x2   :  { %v97_v1 = vunpack.c.l.b16 %v39_v0  ;;  %v348_v6 = vld [vmem:[%s512_s1 + $0x8] sm:$0xff]  ;;  %v347_v7 = vld [vmem:[%s512_s1] sm:$0xff]  ;;  %v341_v9 = vld [vmem:[%s513_s0 + $0x10] sm:$0xff]  ;;  %206 = vst [vmem:[%s516_s4] sm:$0x1] %v367_v27 }
   0x3   :  { %v339_v8 = vld [vmem:[%s513_s0] sm:$0xff]  ;;  %v345_v11 = vld [vmem:[%s513_s0 + $0x30] sm:$0xff]  ;;  %v340_v12 = vld [vmem:[%s513_s0 + $0x8] sm:$0xff] }
   0x4   :  { %v102_v2 = vpack.c.b16 %v97_v1, %v97_v1  ;;  %v343_v10 = vld [vmem:[%s513_s0 + $0x20] sm:$0xff]  ;;  %v342_v13 = vld [vmem:[%s513_s0 + $0x18] sm:$0xff]  ;;  %v344_v14 = vld [vmem:[%s513_s0 + $0x28] sm:$0xff] }
   0x5   :  { %v346_v15 = vld [vmem:[%s513_s0 + $0x38] sm:$0xff] }
   0x6   :  { %v134_v3 = vsel %vm132_vm0, %v102_v2, 0 }
   0x7   :  { %139 = vmatpush.bf16.msra.mxu0 %v134_v3  ;;  %351 = vmatpush.bf16.msra.mxu1 %v134_v3 }
   0x8   :  { %352 = vmatpush.bf16.msra.mxu2 %v134_v3  ;;  %353 = vmatpush.bf16.msra.mxu3 %v134_v3 }
   0x9   :  { %v231_v27 = vld [vmem:[%s516_s4] sm:$0x1] }
   0xb   :  { %140 = vmatpush.bf16.msra.mxu0 %v350_v4  ;;  %354 = vmatpush.bf16.msra.mxu1 %v350_v4 }
   0xc   :  { %355 = vmatpush.bf16.msra.mxu2 %v350_v4  ;;  %356 = vmatpush.bf16.msra.mxu3 %v350_v4 }
   0xf   :  { %141 = vmatpush.bf16.msra.mxu0 %v349_v5  ;;  %357 = vmatpush.bf16.msra.mxu1 %v349_v5 }
  0x10   :  { %358 = vmatpush.bf16.msra.mxu2 %v349_v5  ;;  %359 = vmatpush.bf16.msra.mxu3 %v349_v5 }
  0x13   :  { %142 = vmatpush.bf16.msra.mxu0 %v348_v6  ;;  %360 = vmatpush.bf16.msra.mxu1 %v348_v6 }
  0x14   :  { %361 = vmatpush.bf16.msra.mxu2 %v348_v6  ;;  %362 = vmatpush.bf16.msra.mxu3 %v348_v6 }
  0x17   :  { %143 = vmatpush.bf16.msra.mxu0 %v347_v7  ;;  %363 = vmatpush.bf16.msra.mxu1 %v347_v7 }
  0x18   :  { %364 = vmatpush.bf16.msra.mxu2 %v347_v7  ;;  %365 = vmatpush.bf16.msra.mxu3 %v347_v7 }
  0x1a   :  { %331 = vmatmul.msk.bf16.vlgmr.msra.gmra.mxu0 %vm107_vm1, %v339_v8  ;;  %333 = vmatmul.msk.bf16.vlgmr.msra.gmra.mxu1 %vm107_vm1, %v341_v9 }
  0x1b   :  { %335 = vmatmul.msk.bf16.vlgmr.msra.gmra.mxu2 %vm107_vm1, %v343_v10  ;;  %337 = vmatmul.msk.bf16.vlgmr.msra.gmra.mxu3 %vm107_vm1, %v345_v11 }
  0x2a   :  { %332 = vmatmul.msk.bf16.gmra.mxu0 %vm107_vm1, %v340_v12  ;;  %334 = vmatmul.msk.bf16.gmra.mxu1 %vm107_vm1, %v342_v13 }
  0x2b   :  { %336 = vmatmul.msk.bf16.gmra.mxu2 %vm107_vm1, %v344_v14  ;;  %338 = vmatmul.msk.bf16.gmra.mxu3 %vm107_vm1, %v346_v15 }
  0x97   :  { %v145_v16 = vpop.f32.mrf.mxu0  ;;  %v155_v17 = vpop.f32.mrf.mxu1 }
  0x98   :  { %185 = vst [vmem:[%s514_s2] sm:$0xff] %v145_v16  ;;  %v232_v28 = vmul.f32 %v145_v16, %v145_v16  ;;  %v236_v40 = vmul.f32 %v155_v17, %v155_v17 }
  0x99   :  { %189 = vst [vmem:[%s514_s2 + $0x20] sm:$0xff] %v155_v17 }
  0x9e   :  { %v165_v18 = vpop.f32.mrf.mxu2  ;;  %v446_v19 = vpop.f32.mrf.mxu3 }
  0x9f   :  { %v147_v20 = vpop.f32.mrf.mxu0  ;;  %v157_v21 = vpop.f32.mrf.mxu1  ;;  %193 = vst [vmem:[%s514_s2 + $0x40] sm:$0xff] %v165_v18  ;;  %v240_v54 = vmul.f32 %v165_v18, %v165_v18  ;;  %v244_v2 = vmul.f32 %v446_v19, %v446_v19 }
  0xa0   :  { %186 = vst [vmem:[%s514_s2 + $0x8] sm:$0xff] %v147_v20  ;;  %v233_v26 = vmul.f32 %v147_v20, %v147_v20  ;;  %v208_v29 = vadd.f32 %v147_v20, %v145_v16  ;;  %v237_v43 = vmul.f32 %v157_v21, %v157_v21 }
  0xa1   :  { %190 = vst [vmem:[%s514_s2 + $0x28] sm:$0xff] %v157_v21 }
  0xa2   :  { %197 = vst [vmem:[%s514_s2 + $0x60] sm:$0xff] %v446_v19  ;;  %v248_v31 = vadd.f32 %v233_v26, %v232_v28 }
  0xa6   :  { %v167_v22 = vpop.f32.mrf.mxu2  ;;  %v177_v23 = vpop.f32.mrf.mxu3 }
  0xa7   :  { %v150_v24 = vpop.f32.mrf.mxu0  ;;  %v160_v25 = vpop.f32.mrf.mxu1  ;;  %194 = vst [vmem:[%s514_s2 + $0x48] sm:$0xff] %v167_v22  ;;  %v241_v57 = vmul.f32 %v167_v22, %v167_v22  ;;  %v245_v5 = vmul.f32 %v177_v23, %v177_v23 }
  0xa8   :  { %187 = vst [vmem:[%s514_s2 + $0x10] sm:$0xff] %v150_v24  ;;  %v234_v30 = vmul.f32 %v150_v24, %v150_v24  ;;  %v209_v32 = vadd.f32 %v208_v29, %v150_v24  ;;  %v238_v46 = vmul.f32 %v160_v25, %v160_v25 }
  0xa9   :  { %191 = vst [vmem:[%s514_s2 + $0x30] sm:$0xff] %v160_v25 }
  0xaa   :  { %198 = vst [vmem:[%s514_s2 + $0x68] sm:$0xff] %v177_v23  ;;  %v249_v37 = vadd.f32 %v248_v31, %v234_v30 }
  0xae   :  { %v170_v33 = vpop.f32.mrf.mxu2  ;;  %v180_v34 = vpop.f32.mrf.mxu3 }
  0xaf   :  { %v152_v35 = vpop.f32.mrf.mxu0  ;;  %v162_v36 = vpop.f32.mrf.mxu1  ;;  %195 = vst [vmem:[%s514_s2 + $0x50] sm:$0xff] %v170_v33  ;;  %v242_v61 = vmul.f32 %v170_v33, %v170_v33  ;;  %v246_v9 = vmul.f32 %v180_v34, %v180_v34 }
  0xb0   :  { %188 = vst [vmem:[%s514_s2 + $0x18] sm:$0xff] %v152_v35  ;;  %v210_v38 = vadd.f32 %v209_v32, %v152_v35  ;;  %v235_v39 = vmul.f32 %v152_v35, %v152_v35  ;;  %v239_v52 = vmul.f32 %v162_v36, %v162_v36 }
  0xb1   :  { %192 = vst [vmem:[%s514_s2 + $0x38] sm:$0xff] %v162_v36 }
  0xb2   :  { %v211_v41 = vadd.f32 %v210_v38, %v155_v17  ;;  %v250_v42 = vadd.f32 %v249_v37, %v235_v39  ;;  %199 = vst [vmem:[%s514_s2 + $0x70] sm:$0xff] %v180_v34 }
  0xb4   :  { %v251_v44 = vadd.f32 %v250_v42, %v236_v40  ;;  %v212_v45 = vadd.f32 %v211_v41, %v157_v21 }
  0xb6   :  { %v213_v47 = vadd.f32 %v212_v45, %v160_v25  ;;  %v252_v48 = vadd.f32 %v251_v44, %v237_v43  ;;  %v172_v49 = vpop.f32.mrf.mxu2  ;;  %v182_v50 = vpop.f32.mrf.mxu3 }
  0xb7   :  { %196 = vst [vmem:[%s514_s2 + $0x58] sm:$0xff] %v172_v49  ;;  %v243_v1 = vmul.f32 %v172_v49, %v172_v49  ;;  %v247_v13 = vmul.f32 %v182_v50, %v182_v50 }
  0xb8   :  { %v214_v51 = vadd.f32 %v213_v47, %v162_v36  ;;  %v253_v53 = vadd.f32 %v252_v48, %v238_v46  ;;  %200 = vst [vmem:[%s514_s2 + $0x78] sm:$0xff] %v182_v50 }
  0xba   :  { %v215_v55 = vadd.f32 %v214_v51, %v165_v18  ;;  %v254_v56 = vadd.f32 %v253_v53, %v239_v52 }
  0xbc   :  { %v255_v58 = vadd.f32 %v254_v56, %v240_v54  ;;  %v216_v59 = vadd.f32 %v215_v55, %v167_v22 }
  0xbe   :  { %v217_v60 = vadd.f32 %v216_v59, %v170_v33  ;;  %v256_v62 = vadd.f32 %v255_v58, %v241_v57 }
  0xc0   :  { %v257_v63 = vadd.f32 %v256_v62, %v242_v61  ;;  %v218_v0 = vadd.f32 %v217_v60, %v172_v49 }
  0xc2   :  { %v219_v3 = vadd.f32 %v218_v0, %v446_v19  ;;  %v258_v4 = vadd.f32 %v257_v63, %v243_v1 }
  0xc4   :  { %v259_v6 = vadd.f32 %v258_v4, %v244_v2  ;;  %v220_v7 = vadd.f32 %v219_v3, %v177_v23  ;;  %v207_v23 = vld [vmem:[%s515_s3] sm:$0x1] }
  0xc6   :  { %v221_v8 = vadd.f32 %v220_v7, %v180_v34  ;;  %v260_v10 = vadd.f32 %v259_v6, %v245_v5 }
  0xc8   :  { %v261_v11 = vadd.f32 %v260_v10, %v246_v9  ;;  %v222_v12 = vadd.f32 %v221_v8, %v182_v50 }
  0xca   :  { %v223_v14 = vrot.slane %v222_v12, 4  ;;  %v262_v15 = vadd.f32 %v261_v11, %v247_v13 }
  0xcc   :  { %v224_v16 = vadd.f32 %v223_v14, %v222_v12  ;;  %v263_v17 = vrot.slane %v262_v15, 4 }
  0xce   :  { %v225_v18 = vrot.slane %v224_v16, 2  ;;  %v264_v20 = vadd.f32 %v263_v17, %v262_v15 }
  0xd0   :  { %v226_v21 = vadd.f32 %v225_v18, %v224_v16  ;;  %v265_v22 = vrot.slane %v264_v20, 2 }
  0xd2   :  { %v227_v24 = vrot.slane %v226_v21, 1  ;;  %v266_v19 = vadd.f32 %v265_v22, %v264_v20 }
  0xd4   :  { %v228_v25 = vadd.f32 %v227_v24, %v226_v21  ;;  %v267_v26 = vrot.slane %v266_v19, 1 }
  0xd6   :  { %v229_v28 = vadd.f32 %v228_v25, %v207_v23  ;;  %v268_v29 = vadd.f32 %v267_v26, %v266_v19 }
  0xd8   :  { %230 = vst [vmem:[%s515_s3] sm:$0x1] %v229_v28  ;;  %v269_v30 = vadd.f32 %v268_v29, %v231_v27 }
  0xda   :  { %270 = vst [vmem:[%s516_s4] sm:$0x1] %v269_v30 }

</bundles_post_ra>
